<compile_context>
chip_gen: v6e
topology: v6e:2x2x1
jax: 0.10.0
libtpu: 0.0.40
codegen_flags: <defaults>
</compile_context>

<pallas_src>
import jax
import jax.numpy as jnp
import numpy as np
from jax.experimental import pallas as pl
from jax.experimental.pallas import tpu as pltpu


# ----------------------------- Pallas kernel ---------------------------------
def _conv_fused_kernel(x_ref, w_ref, bias_ref, nslope_ref, o_ref):
    """One spatial tile: single MXU matmul + bias + per-column leaky/relu.

    x_ref:      (tile_hw, 9*Cin)  bf16 im2col patch rows
    w_ref:      (9*Cin, Ctot)     bf16, BN scale pre-folded
    bias_ref:   (1, Ctot)         f32  (beta - mean*scale)
    nslope_ref: (1, Ctot)         f32  negative slope per column (0 => relu)
    o_ref:      (tile_hw, Ctot)   f32
    """
    acc = jnp.dot(x_ref[...], w_ref[...], preferred_element_type=jnp.float32)
    y = acc + bias_ref[...]
    y = jnp.where(y > 0, y, nslope_ref[...] * y)
    o_ref[...] = y.astype(o_ref.dtype)


# ------------------------------ host wrappers ---------------------------------
def _im2col_bf16(x_nhwc):
    """(N,H,W,Cin) f32 -> (N, H*W, 9*Cin) bf16, tap-major/Cin-minor columns."""
    n, h, w, c = x_nhwc.shape
    xp = jnp.pad(x_nhwc.astype(jnp.bfloat16), ((0, 0), (1, 1), (1, 1), (0, 0)))
    cols = [xp[:, kh:kh + h, kw:kw + w, :] for kh in range(3) for kw in range(3)]
    return jnp.concatenate(cols, axis=-1).reshape(n, h * w, 9 * c)


def _pick_spatial_tile(hw, cap=512):
    """Largest multiple-of-8 divisor of hw that is <= cap (else whole hw)."""
    if hw <= cap:
        return hw
    for t in range(cap - cap % 8, 0, -8):
        if hw % t == 0:
            return t
    return hw


def fused_conv3x3_bn(x_nhwc, branches, *, eps=1e-5):
    """Several 3x3 conv+BN(+leaky/relu) branches sharing the same input,
    computed as one Pallas kernel with weights concatenated along Cout.

    branches: list of (w_hwio, gamma, beta, mean, var, neg_slope)
    returns:  (N, H, W, sum(Cout_i)) float32
    """
    n, h, wd, cin = x_nhwc.shape
    k = 9 * cin

    w_cols, b_cols, ns_cols = [], [], []
    for (w, gamma, beta, mean, var, slope) in branches:
        cout = w.shape[-1]
        scale = gamma / jnp.sqrt(var + eps)
        # Fold BN scale into the weights; epilogue is only bias + activation.
        w_cols.append((w.reshape(k, cout) * scale).astype(jnp.bfloat16))
        b_cols.append(beta - mean * scale)
        ns_cols.append(jnp.full((cout,), slope, jnp.float32))
    wmat = jnp.concatenate(w_cols, axis=-1)                    # (K, Ctot) bf16
    bias = jnp.concatenate(b_cols)[None, :].astype(jnp.float32)
    nslope = jnp.concatenate(ns_cols)[None, :]
    ctot = wmat.shape[-1]

    patch = _im2col_bf16(x_nhwc)                               # (N, H*W, K)

    hw = h * wd
    tile = _pick_spatial_tile(hw)
    grid = (n, hw // tile)

    out = pl.pallas_call(
        _conv_fused_kernel,
        out_shape=jax.ShapeDtypeStruct((n, hw, ctot), jnp.float32),
        grid=grid,
        in_specs=[
            pl.BlockSpec((None, tile, k), lambda b, s: (b, s, 0)),
            pl.BlockSpec((k, ctot), lambda b, s: (0, 0)),
            pl.BlockSpec((1, ctot), lambda b, s: (0, 0)),
            pl.BlockSpec((1, ctot), lambda b, s: (0, 0)),
        ],
        out_specs=pl.BlockSpec((None, tile, ctot), lambda b, s: (b, s, 0)),
        compiler_params=pltpu.CompilerParams(
            dimension_semantics=("parallel", "parallel"),
            vmem_limit_bytes=48 * 1024 * 1024),
    )(patch, wmat, bias, nslope)
    return out.reshape(n, h, wd, ctot)


# ------------------------------- SSH module -----------------------------------
def init_ssh_params(key, in_channels, out_channels):
    assert out_channels % 4 == 0
    leaky = 0.1 if out_channels <= 64 else 0.0

    def conv_params(k, cin, cout):
        kw_, kg, kb, km, kv = jax.random.split(k, 5)
        w = jax.random.normal(kw_, (3, 3, cin, cout), jnp.float32) * 0.1
        gamma = jax.random.uniform(kg, (cout,), jnp.float32, 0.5, 1.5)
        beta = jax.random.normal(kb, (cout,), jnp.float32) * 0.1
        mean = jax.random.normal(km, (cout,), jnp.float32) * 0.1
        var = jax.random.uniform(kv, (cout,), jnp.float32, 0.5, 1.5)
        return (w, gamma, beta, mean, var)

    keys = jax.random.split(key, 5)
    return {
        "leaky": leaky,
        "conv33":   conv_params(keys[0], in_channels, out_channels // 2),
        "conv55_1": conv_params(keys[1], in_channels, out_channels // 4),
        "conv55_2": conv_params(keys[2], out_channels // 4, out_channels // 4),
        "conv77_2": conv_params(keys[3], out_channels // 4, out_channels // 4),
        "conv77_3": conv_params(keys[4], out_channels // 4, out_channels // 4),
    }


def ssh_forward(x_nchw, params):
    """Pallas SSH forward. Input/output NCHW (PyTorch convention)."""
    leaky = params["leaky"]
    x = jnp.transpose(x_nchw, (0, 2, 3, 1)).astype(jnp.float32)   # -> NHWC

    c33_w = params["conv33"][0].shape[-1]       # out/2
    c55_w = params["conv55_1"][0].shape[-1]     # out/4

    # Fused kernel 1: conv33 (terminal -> relu, slope 0) + conv55_1 (leaky).
    out1 = fused_conv3x3_bn(
        x, [params["conv33"] + (0.0,), params["conv55_1"] + (leaky,)])
    c33 = out1[..., :c33_w]
    c55_1 = out1[..., c33_w:]

    # Fused kernel 2: conv55_2 (terminal -> relu) + conv77_2 (leaky).
    out2 = fused_conv3x3_bn(
        c55_1, [params["conv55_2"] + (0.0,), params["conv77_2"] + (leaky,)])
    c55 = out2[..., :c55_w]
    c77_2 = out2[..., c55_w:]

    # Kernel 3: conv77_3 (terminal -> relu).
    c77 = fused_conv3x3_bn(c77_2, [params["conv77_3"] + (0.0,)])

    # relu(concat(a,b,c)) == concat(relu(a),relu(b),relu(c)) (already applied).
    out = jnp.concatenate([c33, c55, c77], axis=-1)
    return jnp.transpose(out, (0, 3, 1, 2))                       # -> NCHW


# ----------------------- pure-JAX reference (for checking) --------------------
def _ref_conv_bn(x_nhwc, w, gamma, beta, mean, var, act, leaky, eps=1e-5):
    y = jax.lax.conv_general_dilated(
        x_nhwc, w, window_strides=(1, 1), padding="SAME",
        dimension_numbers=("NHWC", "HWIO", "NHWC"))
    scale = gamma / jnp.sqrt(var + eps)
    y = y * scale + (beta - mean * scale)
    if act == "leaky":
        y = jnp.where(y > 0, y, leaky * y)
    elif act == "relu":
        y = jnp.maximum(y, 0.0)
    return y


def ssh_forward_ref(x_nchw, params):
    leaky = params["leaky"]
    x = jnp.transpose(x_nchw, (0, 2, 3, 1)).astype(jnp.float32)
    c33 = _ref_conv_bn(x, *params["conv33"], act="none", leaky=0.0)
    c55_1 = _ref_conv_bn(x, *params["conv55_1"], act="leaky", leaky=leaky)
    c55 = _ref_conv_bn(c55_1, *params["conv55_2"], act="none", leaky=0.0)
    c77_2 = _ref_conv_bn(c55_1, *params["conv77_2"], act="leaky", leaky=leaky)
    c77 = _ref_conv_bn(c77_2, *params["conv77_3"], act="none", leaky=0.0)
    out = jnp.maximum(jnp.concatenate([c33, c55, c77], axis=-1), 0.0)
    return jnp.transpose(out, (0, 3, 1, 2))


if __name__ == "__main__":
    key = jax.random.PRNGKey(0)
    k_x, k_p = jax.random.split(key)

    N, C_IN, H, W = 2, 8, 16, 16
    C_OUT = 16  # divisible by 4; <= 64 so leaky = 0.1

    x = jax.random.normal(k_x, (N, C_IN, H, W), jnp.float32)
    params = init_ssh_params(k_p, C_IN, C_OUT)

    ssh_jit = jax.jit(ssh_forward)
    out = jax.block_until_ready(ssh_jit(x, params))
    ref = jax.block_until_ready(ssh_forward_ref(x, params))

    assert out.shape == (N, C_OUT, H, W), out.shape
    # bf16 MXU path -> looser tolerance than the pure-f32 reference.
    np.testing.assert_allclose(np.asarray(out), np.asarray(ref),
                               rtol=2e-2, atol=2e-2)
    print("KERNEL_OK")
</pallas_src>

<mosaic_0001>
module attributes {stable_mosaic.version = 11 : i64} {
  func.func @_conv_fused_kernel(%arg0: i32, %arg1: i32, %arg2: memref<1x256x72xbf16, #tpu.memory_space<vmem>>, %arg3: memref<72x12xbf16, #tpu.memory_space<vmem>>, %arg4: memref<1x12xf32, #tpu.memory_space<vmem>>, %arg5: memref<1x12xf32, #tpu.memory_space<vmem>>, %arg6: memref<1x256x12xf32, #tpu.memory_space<vmem>>) attributes {dimension_semantics = [#tpu.dimension_semantics<parallel>, #tpu.dimension_semantics<parallel>], iteration_bounds = array<i64: 2, 1>, scalar_prefetch = 0 : i64, scratch_operands = 0 : i64, tpu.core_type = #tpu.core_type<tc>, window_params = [{transform_indices = @transform_0, window_bounds = array<i64: 1, 256, 72>}, {pipeline_mode = #tpu.pipeline_mode<synchronous>, transform_indices = @transform_1, window_bounds = array<i64: 72, 12>}, {pipeline_mode = #tpu.pipeline_mode<synchronous>, transform_indices = @transform_2, window_bounds = array<i64: 1, 12>}, {pipeline_mode = #tpu.pipeline_mode<synchronous>, transform_indices = @transform_3, window_bounds = array<i64: 1, 12>}, {transform_indices = @transform_4, window_bounds = array<i64: 1, 256, 12>}]} {
    %c0 = arith.constant 0 : index
    %c0_0 = arith.constant 0 : index
    %c0_1 = arith.constant 0 : index
    %0 = vector.load %arg2[%c0, %c0_0, %c0_1] : memref<1x256x72xbf16, #tpu.memory_space<vmem>>, vector<1x256x72xbf16>
    %1 = vector.shape_cast %0 : vector<1x256x72xbf16> to vector<256x72xbf16>
    %c0_2 = arith.constant 0 : index
    %c0_3 = arith.constant 0 : index
    %2 = vector.load %arg3[%c0_2, %c0_3] : memref<72x12xbf16, #tpu.memory_space<vmem>>, vector<72x12xbf16>
    %cst = arith.constant dense<0.000000e+00> : vector<256x12xf32>
    %3 = tpu.matmul %1, %2, %cst {dimension_numbers = #tpu.dot_dimension_numbers<[1], [0], [0], [1], [0, 0, 1, 1], [], []>} : vector<256x72xbf16>, vector<72x12xbf16>, vector<256x12xf32> -> vector<256x12xf32>
    %c0_4 = arith.constant 0 : index
    %c0_5 = arith.constant 0 : index
    %4 = vector.load %arg4[%c0_4, %c0_5] : memref<1x12xf32, #tpu.memory_space<vmem>>, vector<1x12xf32>
    %5 = vector.broadcast %4 : vector<1x12xf32> to vector<256x12xf32>
    %6 = arith.addf %3, %5 : vector<256x12xf32>
    %cst_6 = arith.constant 0.000000e+00 : f32
    %7 = vector.broadcast %cst_6 : f32 to vector<256x12xf32>
    %8 = arith.cmpf ogt, %6, %7 : vector<256x12xf32>
    %c0_7 = arith.constant 0 : index
    %c0_8 = arith.constant 0 : index
    %9 = vector.load %arg5[%c0_7, %c0_8] : memref<1x12xf32, #tpu.memory_space<vmem>>, vector<1x12xf32>
    %10 = vector.broadcast %9 : vector<1x12xf32> to vector<256x12xf32>
    %11 = arith.mulf %10, %6 : vector<256x12xf32>
    %12 = arith.select %8, %6, %11 : vector<256x12xi1>, vector<256x12xf32>
    %c0_9 = arith.constant 0 : index
    %c0_10 = arith.constant 0 : index
    %c0_11 = arith.constant 0 : index
    %13 = vector.load %arg6[%c0_9, %c0_10, %c0_11] : memref<1x256x12xf32, #tpu.memory_space<vmem>>, vector<1x256x12xf32>
    %14 = vector.shape_cast %13 : vector<1x256x12xf32> to vector<256x12xf32>
    %15 = vector.shape_cast %12 : vector<256x12xf32> to vector<1x256x12xf32>
    tpu.vector_store %arg6[%c0_9, %c0_10, %c0_11], %15 {strides = array<i32>} : memref<1x256x12xf32, #tpu.memory_space<vmem>>, vector<1x256x12xf32>,
    return
  }
  func.func @transform_0(%arg0: i32, %arg1: i32) -> (i32, i32, i32) {
    %c0_i32 = arith.constant 0 : i32
    %c0_i32_0 = arith.constant 0 : i32
    return %arg0, %arg1, %c0_i32 : i32, i32, i32
  }
  func.func @transform_1(%arg0: i32, %arg1: i32) -> (i32, i32) {
    %c0_i32 = arith.constant 0 : i32
    %c0_i32_0 = arith.constant 0 : i32
    %c0_i32_1 = arith.constant 0 : i32
    return %c0_i32, %c0_i32_0 : i32, i32
  }
  func.func @transform_2(%arg0: i32, %arg1: i32) -> (i32, i32) {
    %c0_i32 = arith.constant 0 : i32
    %c0_i32_0 = arith.constant 0 : i32
    %c0_i32_1 = arith.constant 0 : i32
    return %c0_i32, %c0_i32_0 : i32, i32
  }
  func.func @transform_3(%arg0: i32, %arg1: i32) -> (i32, i32) {
    %c0_i32 = arith.constant 0 : i32
    %c0_i32_0 = arith.constant 0 : i32
    %c0_i32_1 = arith.constant 0 : i32
    return %c0_i32, %c0_i32_0 : i32, i32
  }
  func.func @transform_4(%arg0: i32, %arg1: i32) -> (i32, i32, i32) {
    %c0_i32 = arith.constant 0 : i32
    %c0_i32_0 = arith.constant 0 : i32
    return %arg0, %arg1, %c0_i32 : i32, i32, i32
  }
}

module attributes {stable_mosaic.version = 11 : i64} {
  func.func @_conv_fused_kernel(%arg0: i32, %arg1: i32, %arg2: memref<1x256x36xbf16, #tpu.memory_space<vmem>>, %arg3: memref<36x8xbf16, #tpu.memory_space<vmem>>, %arg4: memref<1x8xf32, #tpu.memory_space<vmem>>, %arg5: memref<1x8xf32, #tpu.memory_space<vmem>>, %arg6: memref<1x256x8xf32, #tpu.memory_space<vmem>>) attributes {dimension_semantics = [#tpu.dimension_semantics<parallel>, #tpu.dimension_semantics<parallel>], iteration_bounds = array<i64: 2, 1>, scalar_prefetch = 0 : i64, scratch_operands = 0 : i64, tpu.core_type = #tpu.core_type<tc>, window_params = [{transform_indices = @transform_0, window_bounds = array<i64: 1, 256, 36>}, {pipeline_mode = #tpu.pipeline_mode<synchronous>, transform_indices = @transform_1, window_bounds = array<i64: 36, 8>}, {pipeline_mode = #tpu.pipeline_mode<synchronous>, transform_indices = @transform_2, window_bounds = array<i64: 1, 8>}, {pipeline_mode = #tpu.pipeline_mode<synchronous>, transform_indices = @transform_3, window_bounds = array<i64: 1, 8>}, {transform_indices = @transform_4, window_bounds = array<i64: 1, 256, 8>}]} {
    %c0 = arith.constant 0 : index
    %c0_0 = arith.constant 0 : index
    %c0_1 = arith.constant 0 : index
    %0 = vector.load %arg2[%c0, %c0_0, %c0_1] : memref<1x256x36xbf16, #tpu.memory_space<vmem>>, vector<1x256x36xbf16>
    %1 = vector.shape_cast %0 : vector<1x256x36xbf16> to vector<256x36xbf16>
    %c0_2 = arith.constant 0 : index
    %c0_3 = arith.constant 0 : index
    %2 = vector.load %arg3[%c0_2, %c0_3] : memref<36x8xbf16, #tpu.memory_space<vmem>>, vector<36x8xbf16>
    %cst = arith.constant dense<0.000000e+00> : vector<256x8xf32>
    %3 = tpu.matmul %1, %2, %cst {dimension_numbers = #tpu.dot_dimension_numbers<[1], [0], [0], [1], [0, 0, 1, 1], [], []>} : vector<256x36xbf16>, vector<36x8xbf16>, vector<256x8xf32> -> vector<256x8xf32>
    %c0_4 = arith.constant 0 : index
    %c0_5 = arith.constant 0 : index
    %4 = vector.load %arg4[%c0_4, %c0_5] : memref<1x8xf32, #tpu.memory_space<vmem>>, vector<1x8xf32>
    %5 = vector.broadcast %4 : vector<1x8xf32> to vector<256x8xf32>
    %6 = arith.addf %3, %5 : vector<256x8xf32>
    %cst_6 = arith.constant 0.000000e+00 : f32
    %7 = vector.broadcast %cst_6 : f32 to vector<256x8xf32>
    %8 = arith.cmpf ogt, %6, %7 : vector<256x8xf32>
    %c0_7 = arith.constant 0 : index
    %c0_8 = arith.constant 0 : index
    %9 = vector.load %arg5[%c0_7, %c0_8] : memref<1x8xf32, #tpu.memory_space<vmem>>, vector<1x8xf32>
    %10 = vector.broadcast %9 : vector<1x8xf32> to vector<256x8xf32>
    %11 = arith.mulf %10, %6 : vector<256x8xf32>
    %12 = arith.select %8, %6, %11 : vector<256x8xi1>, vector<256x8xf32>
    %c0_9 = arith.constant 0 : index
    %c0_10 = arith.constant 0 : index
    %c0_11 = arith.constant 0 : index
    %13 = vector.load %arg6[%c0_9, %c0_10, %c0_11] : memref<1x256x8xf32, #tpu.memory_space<vmem>>, vector<1x256x8xf32>
    %14 = vector.shape_cast %13 : vector<1x256x8xf32> to vector<256x8xf32>
    %15 = vector.shape_cast %12 : vector<256x8xf32> to vector<1x256x8xf32>
    tpu.vector_store %arg6[%c0_9, %c0_10, %c0_11], %15 {strides = array<i32>} : memref<1x256x8xf32, #tpu.memory_space<vmem>>, vector<1x256x8xf32>,
    return
  }
  func.func @transform_0(%arg0: i32, %arg1: i32) -> (i32, i32, i32) {
    %c0_i32 = arith.constant 0 : i32
    %c0_i32_0 = arith.constant 0 : i32
    return %arg0, %arg1, %c0_i32 : i32, i32, i32
  }
  func.func @transform_1(%arg0: i32, %arg1: i32) -> (i32, i32) {
    %c0_i32 = arith.constant 0 : i32
    %c0_i32_0 = arith.constant 0 : i32
    %c0_i32_1 = arith.constant 0 : i32
    return %c0_i32, %c0_i32_0 : i32, i32
  }
  func.func @transform_2(%arg0: i32, %arg1: i32) -> (i32, i32) {
    %c0_i32 = arith.constant 0 : i32
    %c0_i32_0 = arith.constant 0 : i32
    %c0_i32_1 = arith.constant 0 : i32
    return %c0_i32, %c0_i32_0 : i32, i32
  }
  func.func @transform_3(%arg0: i32, %arg1: i32) -> (i32, i32) {
    %c0_i32 = arith.constant 0 : i32
    %c0_i32_0 = arith.constant 0 : i32
    %c0_i32_1 = arith.constant 0 : i32
    return %c0_i32, %c0_i32_0 : i32, i32
  }
  func.func @transform_4(%arg0: i32, %arg1: i32) -> (i32, i32, i32) {
    %c0_i32 = arith.constant 0 : i32
    %c0_i32_0 = arith.constant 0 : i32
    return %arg0, %arg1, %c0_i32 : i32, i32, i32
  }
}

module attributes {stable_mosaic.version = 11 : i64} {
  func.func @_conv_fused_kernel(%arg0: i32, %arg1: i32, %arg2: memref<1x256x36xbf16, #tpu.memory_space<vmem>>, %arg3: memref<36x4xbf16, #tpu.memory_space<vmem>>, %arg4: memref<1x4xf32, #tpu.memory_space<vmem>>, %arg5: memref<1x4xf32, #tpu.memory_space<vmem>>, %arg6: memref<1x256x4xf32, #tpu.memory_space<vmem>>) attributes {dimension_semantics = [#tpu.dimension_semantics<parallel>, #tpu.dimension_semantics<parallel>], iteration_bounds = array<i64: 2, 1>, scalar_prefetch = 0 : i64, scratch_operands = 0 : i64, tpu.core_type = #tpu.core_type<tc>, window_params = [{transform_indices = @transform_0, window_bounds = array<i64: 1, 256, 36>}, {pipeline_mode = #tpu.pipeline_mode<synchronous>, transform_indices = @transform_1, window_bounds = array<i64: 36, 4>}, {pipeline_mode = #tpu.pipeline_mode<synchronous>, transform_indices = @transform_2, window_bounds = array<i64: 1, 4>}, {pipeline_mode = #tpu.pipeline_mode<synchronous>, transform_indices = @transform_3, window_bounds = array<i64: 1, 4>}, {transform_indices = @transform_4, window_bounds = array<i64: 1, 256, 4>}]} {
    %c0 = arith.constant 0 : index
    %c0_0 = arith.constant 0 : index
    %c0_1 = arith.constant 0 : index
    %0 = vector.load %arg2[%c0, %c0_0, %c0_1] : memref<1x256x36xbf16, #tpu.memory_space<vmem>>, vector<1x256x36xbf16>
    %1 = vector.shape_cast %0 : vector<1x256x36xbf16> to vector<256x36xbf16>
    %c0_2 = arith.constant 0 : index
    %c0_3 = arith.constant 0 : index
    %2 = vector.load %arg3[%c0_2, %c0_3] : memref<36x4xbf16, #tpu.memory_space<vmem>>, vector<36x4xbf16>
    %cst = arith.constant dense<0.000000e+00> : vector<256x4xf32>
    %3 = tpu.matmul %1, %2, %cst {dimension_numbers = #tpu.dot_dimension_numbers<[1], [0], [0], [1], [0, 0, 1, 1], [], []>} : vector<256x36xbf16>, vector<36x4xbf16>, vector<256x4xf32> -> vector<256x4xf32>
    %c0_4 = arith.constant 0 : index
    %c0_5 = arith.constant 0 : index
    %4 = vector.load %arg4[%c0_4, %c0_5] : memref<1x4xf32, #tpu.memory_space<vmem>>, vector<1x4xf32>
    %5 = vector.broadcast %4 : vector<1x4xf32> to vector<256x4xf32>
    %6 = arith.addf %3, %5 : vector<256x4xf32>
    %cst_6 = arith.constant 0.000000e+00 : f32
    %7 = vector.broadcast %cst_6 : f32 to vector<256x4xf32>
    %8 = arith.cmpf ogt, %6, %7 : vector<256x4xf32>
    %c0_7 = arith.constant 0 : index
    %c0_8 = arith.constant 0 : index
    %9 = vector.load %arg5[%c0_7, %c0_8] : memref<1x4xf32, #tpu.memory_space<vmem>>, vector<1x4xf32>
    %10 = vector.broadcast %9 : vector<1x4xf32> to vector<256x4xf32>
    %11 = arith.mulf %10, %6 : vector<256x4xf32>
    %12 = arith.select %8, %6, %11 : vector<256x4xi1>, vector<256x4xf32>
    %c0_9 = arith.constant 0 : index
    %c0_10 = arith.constant 0 : index
    %c0_11 = arith.constant 0 : index
    %13 = vector.load %arg6[%c0_9, %c0_10, %c0_11] : memref<1x256x4xf32, #tpu.memory_space<vmem>>, vector<1x256x4xf32>
    %14 = vector.shape_cast %13 : vector<1x256x4xf32> to vector<256x4xf32>
    %15 = vector.shape_cast %12 : vector<256x4xf32> to vector<1x256x4xf32>
    tpu.vector_store %arg6[%c0_9, %c0_10, %c0_11], %15 {strides = array<i32>} : memref<1x256x4xf32, #tpu.memory_space<vmem>>, vector<1x256x4xf32>,
    return
  }
  func.func @transform_0(%arg0: i32, %arg1: i32) -> (i32, i32, i32) {
    %c0_i32 = arith.constant 0 : i32
    %c0_i32_0 = arith.constant 0 : i32
    return %arg0, %arg1, %c0_i32 : i32, i32, i32
  }
  func.func @transform_1(%arg0: i32, %arg1: i32) -> (i32, i32) {
    %c0_i32 = arith.constant 0 : i32
    %c0_i32_0 = arith.constant 0 : i32
    %c0_i32_1 = arith.constant 0 : i32
    return %c0_i32, %c0_i32_0 : i32, i32
  }
  func.func @transform_2(%arg0: i32, %arg1: i32) -> (i32, i32) {
    %c0_i32 = arith.constant 0 : i32
    %c0_i32_0 = arith.constant 0 : i32
    %c0_i32_1 = arith.constant 0 : i32
    return %c0_i32, %c0_i32_0 : i32, i32
  }
  func.func @transform_3(%arg0: i32, %arg1: i32) -> (i32, i32) {
    %c0_i32 = arith.constant 0 : i32
    %c0_i32_0 = arith.constant 0 : i32
    %c0_i32_1 = arith.constant 0 : i32
    return %c0_i32, %c0_i32_0 : i32, i32
  }
  func.func @transform_4(%arg0: i32, %arg1: i32) -> (i32, i32, i32) {
    %c0_i32 = arith.constant 0 : i32
    %c0_i32_0 = arith.constant 0 : i32
    return %arg0, %arg1, %c0_i32 : i32, i32, i32
  }
}

</mosaic_0001>

<bundles_post_ra>
// kernel: ssh_forward.3
= control target key start
LH: loop header
LB: loop body
LE: loop exit
PB: predicated region body
PF: predicated region fallthrough
CT: control target
= control target key end

     0   :  { %s1051_s15 = smov 0   ;;  %s1053_s16 = smov 0   ;;  %s1277_s0 = inlined_call_operand.vmem [shape: bf16[2,256,72], index: 0, kind: input, shape index: {}]   ;;  %s1278_s1 = inlined_call_operand.vmem [shape: bf16[72,12], index: 1, kind: input, shape index: {}]   ;;  %s1279_s2 = inlined_call_operand.vmem [shape: f32[1,12], index: 2, kind: input, shape index: {}]   ;;  %s1280_s3 = inlined_call_operand.vmem [shape: f32[1,12], index: 3, kind: input, shape index: {}]   ;;  %s1281_s4 = inlined_call_operand.vmem [shape: f32[2,256,12], index: 4, kind: output, shape index: {}]  }
   0x1   :  { %s1055_s17 = smov 0  }
   0x2 LB: > { %s26_s18 = sadd.s32 1, %s1020_s16  ;;  %p834_p0 = scmp.ge.s32.totalorder %s1024_s17, 1  ;;  %s1024_s17 = sphi %s1055_s17, %s14_s17   ;;  %s1020_s16 = sphi %s1053_s16, %s1283_s16   ;;  %s1016_s15 = sphi %s1051_s15, %s1282_s15  }
   0x3   : > { %p28_p1 = scmp.ge.s32.totalorder %s26_s18, 2  ;;  %p183_p2 = scmp.lt.s32.totalorder %s1024_s17, 3 }
   0x5   : > { %s1285_s18 = smov (%p28_p1, %s26_s18), 0  ;;  %p184_p3 = pnand %p834_p0, %p183_p2 }
   0x6   : > { %p218_p4 = scmp.lt.s32.totalorder (!%p184_p3), %s1016_s15, 1 }
   0x7   : > { %187 = sbr.rel (%p184_p3) target bundleno = 264 (0x108), region = 36 }
   0xc   : > { %v981_v0 = vld [vmem:[%s1278_s1 + $0x20] ss:$0 sps:$4 sm:$0xff]   ;;  %vm442_vm0 = vcmask 1043456   ;;  %v982_v1 = vld [vmem:[%s1278_s1 + $0x18] sm:$0xff]   ;;  %v983_v3 = vld [vmem:[%s1278_s1 + $0x10] sm:$0xff]   ;;  %s1287_s15 = smov (!%p218_p4, %s1016_s15), 1 }
   0xd   : > { %955 = vmatprep.subr.msk.bf16.mxu0 %vm442_vm0, %v981_v0  ;;  %956 = vmatprep.subr.msk.bf16.mxu1 %vm442_vm0, %v981_v0  ;;  %v444_v2 = vsel %vm442_vm0, %v981_v0, 0  ;;  %s880_s25 = sshll.u32 %s1287_s15, 7  ;;  %v984_v4 = vld [vmem:[%s1278_s1 + $0x8] sm:$0xff]   ;;  %vm393_vm1 = vcmask 588800   ;;  %v985_v7 = vld [vmem:[%s1278_s1] sm:$0xff]   ;;  %s881_s9 = sshll.u32 %s1287_s15, 8 }
   0xe   : > { %904 = vmatpush3.bf16.msra.mxu0 %v444_v2  ;;  %950 = vmatpush3.bf16.msra.mxu1 %v444_v2  ;;  %s1087_s30 = scalar_lea.vmem %s1277_s0, %s880_s25  ;;  %v1127_v22 = vld [vmem:[%s1279_s2] ss:$0 sm:$0xff]  ;;  %vm710_vm2 = vcmask 97280   ;;  %s1140_s14 = scalar_lea.vmem %s1281_s4, %s881_s9 }
   0xf   : > { %905 = vmatprep.subr.bf16.mxu0 %v982_v1  ;;  %946 = vmatprep.subr.bf16.mxu1 %v982_v1  ;;  %v986_v5 = vld [vmem:[%s1087_s30] sm:$0xff]   ;;  %v988_v8 = vld [vmem:[%s1087_s30 + $0x8] sm:$0xff]   ;;  %v990_v10 = vld [vmem:[%s1087_s30 + $0x10] sm:$0xff]  }
  0x10   : > { %v987_v6 = vld [vmem:[%s1087_s30 + $0x40] sm:$0xff]   ;;  %913 = vmatprep.mubr.msk.bf16.mxu0 %vm393_vm1, %v986_v5  ;;  %v989_v9 = vld [vmem:[%s1087_s30 + $0x48] sm:$0xff]   ;;  %v991_v11 = vld [vmem:[%s1087_s30 + $0x50] sm:$0xff]  }
  0x11   : > { %929 = vmatprep.mubr.msk.bf16.mxu1 %vm393_vm1, %v987_v6  ;;  %v992_v12 = vld [vmem:[%s1087_s30 + $0x18] sm:$0xff]   ;;  %v994_v14 = vld [vmem:[%s1087_s30 + $0x20] sm:$0xff]   ;;  %v996_v16 = vld [vmem:[%s1087_s30 + $0x28] sm:$0xff]  }
  0x12   : > { %906 = vmatpush3.bf16.msra.mxu0 %v982_v1  ;;  %951 = vmatpush3.bf16.msra.mxu1 %v982_v1  ;;  %v993_v13 = vld [vmem:[%s1087_s30 + $0x58] sm:$0xff]   ;;  %v995_v15 = vld [vmem:[%s1087_s30 + $0x60] sm:$0xff]   ;;  %v997_v17 = vld [vmem:[%s1087_s30 + $0x68] sm:$0xff]  }
  0x13   : > { %907 = vmatprep.subr.bf16.mxu0 %v983_v3  ;;  %947 = vmatprep.subr.bf16.mxu1 %v983_v3  ;;  %v998_v18 = vld [vmem:[%s1087_s30 + $0x30] sm:$0xff]   ;;  %v1000_v20 = vld [vmem:[%s1087_s30 + $0x38] sm:$0xff]   ;;  %v1133_v24 = vld [vmem:[%s1280_s3] ss:$0 sm:$0xff] }
  0x14   : > { %v999_v19 = vld [vmem:[%s1087_s30 + $0x70] sm:$0xff]   ;;  %v1001_v21 = vld [vmem:[%s1087_s30 + $0x78] sm:$0xff]  }
  0x16   : > { %908 = vmatpush3.bf16.msra.mxu0 %v983_v3  ;;  %952 = vmatpush3.bf16.msra.mxu1 %v983_v3 }
  0x17   : > { %909 = vmatprep.subr.bf16.mxu0 %v984_v4  ;;  %948 = vmatprep.subr.bf16.mxu1 %v984_v4 }
  0x1a   : > { %910 = vmatpush3.bf16.msra.mxu0 %v984_v4  ;;  %953 = vmatpush3.bf16.msra.mxu1 %v984_v4 }
  0x1b   : > { %911 = vmatprep.subr.bf16.mxu0 %v985_v7  ;;  %949 = vmatprep.subr.bf16.mxu1 %v985_v7 }
  0x1e   : > { %912 = vmatpush3.bf16.msra.mxu0 %v985_v7  ;;  %954 = vmatpush3.bf16.msra.mxu1 %v985_v7 }
  0x21   : > { %914 = vmatmul.mubr.msk.bf16.vlgmr.msra.gmra.mxu0 %vm393_vm1, %v988_v8  ;;  %930 = vmatmul.mubr.msk.bf16.vlgmr.msra.gmra.mxu1 %vm393_vm1, %v989_v9 }
  0x22   : > { %917 = vmatprep.mubr.msk.bf16.mxu0 %vm393_vm1, %v990_v10  ;;  %933 = vmatprep.mubr.msk.bf16.mxu1 %vm393_vm1, %v991_v11 }
  0x29   : > { %918 = vmatmul.mubr.msk.bf16.gmra.mxu0 %vm393_vm1, %v992_v12  ;;  %934 = vmatmul.mubr.msk.bf16.gmra.mxu1 %vm393_vm1, %v993_v13 }
  0x2a   : > { %921 = vmatprep.mubr.msk.bf16.mxu0 %vm393_vm1, %v994_v14  ;;  %937 = vmatprep.mubr.msk.bf16.mxu1 %vm393_vm1, %v995_v15 }
  0x31   : > { %922 = vmatmul.mubr.msk.bf16.gmra.mxu0 %vm393_vm1, %v996_v16  ;;  %938 = vmatmul.mubr.msk.bf16.gmra.mxu1 %vm393_vm1, %v997_v17 }
  0x32   : > { %925 = vmatprep.mubr.msk.bf16.mxu0 %vm393_vm1, %v998_v18  ;;  %941 = vmatprep.mubr.msk.bf16.mxu1 %vm393_vm1, %v999_v19 }
  0x39   : > { %926 = vmatmul.mubr.msk.bf16.gmra.mxu0 %vm393_vm1, %v1000_v20  ;;  %942 = vmatmul.mubr.msk.bf16.gmra.mxu1 %vm393_vm1, %v1001_v21 }
  0xe1   : > { %v915_v23 = vpop.f32.mrf.mxu0  ;;  %v931_v25 = vpop.f32.mrf.mxu1 }
  0xe2   : > { %v489_v26 = vadd.f32 %v915_v23, %v1127_v22  ;;  %v553_v27 = vadd.f32 %v931_v25, %v1127_v22 }
  0xe3   : > { %v480_v28 = vpop.f32.mrf.mxu0  ;;  %v544_v29 = vpop.f32.mrf.mxu1 }
  0xe4   : > { %vm609_vm3 = vcmp.gt.f32.partialorder %v489_v26, 0.0  ;;  %v648_v30 = vmul.f32 %v1133_v24, %v489_v26  ;;  %vm625_vm4 = vcmp.gt.f32.partialorder %v553_v27, 0.0  ;;  %v664_v31 = vmul.f32 %v1133_v24, %v553_v27 }
  0xe5   : > { %v481_v32 = vadd.f32 %v1127_v22, %v480_v28  ;;  %v545_v33 = vadd.f32 %v1127_v22, %v544_v29  ;;  %v916_v34 = vpop.f32.mrf.mxu0  ;;  %v932_v35 = vpop.f32.mrf.mxu1 }
  0xe6   : > { %v680_v36 = vsel %vm609_vm3, %v489_v26, %v648_v30  ;;  %v696_v37 = vsel %vm625_vm4, %v553_v27, %v664_v31  ;;  %v492_v38 = vadd.f32 %v916_v34, %v1127_v22  ;;  %v556_v39 = vadd.f32 %v932_v35, %v1127_v22 }
  0xe7   : > { %713 = vst.msk [vmem:[%s1140_s14 + $0x10] sm:$0xff] %vm710_vm2, %v680_v36  ;;  %729 = vst.msk [vmem:[%s1140_s14 + $0x90] sm:$0xff] %vm710_vm2, %v696_v37  ;;  %vm607_vm5 = vcmp.gt.f32.partialorder %v481_v32, 0.0  ;;  %v646_v40 = vmul.f32 %v1133_v24, %v481_v32  ;;  %vm623_vm6 = vcmp.gt.f32.partialorder %v545_v33, 0.0  ;;  %v662_v41 = vmul.f32 %v1133_v24, %v545_v33  ;;  %v483_v42 = vpop.f32.mrf.mxu0  ;;  %v547_v43 = vpop.f32.mrf.mxu1 }
  0xe8   : > { %vm610_vm7 = vcmp.gt.f32.partialorder %v492_v38, 0.0  ;;  %v649_v44 = vmul.f32 %v1133_v24, %v492_v38  ;;  %vm626_vm8 = vcmp.gt.f32.partialorder %v556_v39, 0.0  ;;  %v665_v45 = vmul.f32 %v1133_v24, %v556_v39 }
  0xe9   : > { %v678_v46 = vsel %vm607_vm5, %v481_v32, %v646_v40  ;;  %v694_v47 = vsel %vm623_vm6, %v545_v33, %v662_v41  ;;  %v484_v48 = vadd.f32 %v1127_v22, %v483_v42  ;;  %v548_v49 = vadd.f32 %v1127_v22, %v547_v43  ;;  %v919_v50 = vpop.f32.mrf.mxu0  ;;  %v935_v51 = vpop.f32.mrf.mxu1 }
  0xea   : > { %711 = vst.msk [vmem:[%s1140_s14] sm:$0xff] %vm710_vm2, %v678_v46  ;;  %727 = vst.msk [vmem:[%s1140_s14 + $0x80] sm:$0xff] %vm710_vm2, %v694_v47  ;;  %v681_v52 = vsel %vm610_vm7, %v492_v38, %v649_v44  ;;  %v697_v53 = vsel %vm626_vm8, %v556_v39, %v665_v45  ;;  %v505_v54 = vadd.f32 %v919_v50, %v1127_v22 }
  0xeb   : > { %v569_v55 = vadd.f32 %v935_v51, %v1127_v22  ;;  %714 = vst.msk [vmem:[%s1140_s14 + $0x18] sm:$0xff] %vm710_vm2, %v681_v52  ;;  %730 = vst.msk [vmem:[%s1140_s14 + $0x98] sm:$0xff] %vm710_vm2, %v697_v53  ;;  %vm608_vm9 = vcmp.gt.f32.partialorder %v484_v48, 0.0  ;;  %v647_v56 = vmul.f32 %v1133_v24, %v484_v48  ;;  %vm624_vm10 = vcmp.gt.f32.partialorder %v548_v49, 0.0  ;;  %v496_v58 = vpop.f32.mrf.mxu0  ;;  %v560_v59 = vpop.f32.mrf.mxu1 }
  0xec   : > { %v663_v57 = vmul.f32 %v1133_v24, %v548_v49  ;;  %vm613_vm11 = vcmp.gt.f32.partialorder %v505_v54, 0.0  ;;  %v652_v60 = vmul.f32 %v1133_v24, %v505_v54  ;;  %v497_v0 = vadd.f32 %v1127_v22, %v496_v58 }
  0xed   : > { %vm629_vm12 = vcmp.gt.f32.partialorder %v569_v55, 0.0  ;;  %v668_v61 = vmul.f32 %v1133_v24, %v569_v55  ;;  %v679_v62 = vsel %vm608_vm9, %v484_v48, %v647_v56  ;;  %v561_v1 = vadd.f32 %v1127_v22, %v560_v59  ;;  %v920_v2 = vpop.f32.mrf.mxu0  ;;  %v936_v3 = vpop.f32.mrf.mxu1 }
  0xee   : > { %v695_v63 = vsel %vm624_vm10, %v548_v49, %v663_v57  ;;  %712 = vst.msk [vmem:[%s1140_s14 + $0x8] sm:$0xff] %vm710_vm2, %v679_v62  ;;  %v684_v4 = vsel %vm613_vm11, %v505_v54, %v652_v60  ;;  %v508_v6 = vadd.f32 %v920_v2, %v1127_v22  ;;  %v572_v7 = vadd.f32 %v936_v3, %v1127_v22 }
  0xef   : > { %728 = vst.msk [vmem:[%s1140_s14 + $0x88] sm:$0xff] %vm710_vm2, %v695_v63  ;;  %v700_v5 = vsel %vm629_vm12, %v569_v55, %v668_v61  ;;  %717 = vst.msk [vmem:[%s1140_s14 + $0x30] sm:$0xff] %vm710_vm2, %v684_v4  ;;  %vm611_vm13 = vcmp.gt.f32.partialorder %v497_v0, 0.0  ;;  %v650_v8 = vmul.f32 %v1133_v24, %v497_v0  ;;  %vm627_vm14 = vcmp.gt.f32.partialorder %v561_v1, 0.0  ;;  %v499_v10 = vpop.f32.mrf.mxu0  ;;  %v563_v11 = vpop.f32.mrf.mxu1 }
  0xf0   : > { %733 = vst.msk [vmem:[%s1140_s14 + $0xb0] sm:$0xff] %vm710_vm2, %v700_v5  ;;  %v666_v9 = vmul.f32 %v1133_v24, %v561_v1  ;;  %vm614_vm15 = vcmp.gt.f32.partialorder %v508_v6, 0.0  ;;  %v653_v12 = vmul.f32 %v1133_v24, %v508_v6  ;;  %vm630_vm0 = vcmp.gt.f32.partialorder %v572_v7, 0.0 }
  0xf1   : > { %v669_v13 = vmul.f32 %v1133_v24, %v572_v7  ;;  %v682_v14 = vsel %vm611_vm13, %v497_v0, %v650_v8  ;;  %v500_v16 = vadd.f32 %v1127_v22, %v499_v10  ;;  %v564_v17 = vadd.f32 %v1127_v22, %v563_v11  ;;  %v923_v18 = vpop.f32.mrf.mxu0  ;;  %v939_v19 = vpop.f32.mrf.mxu1 }
  0xf2   : > { %v698_v15 = vsel %vm627_vm14, %v561_v1, %v666_v9  ;;  %715 = vst.msk [vmem:[%s1140_s14 + $0x20] sm:$0xff] %vm710_vm2, %v682_v14  ;;  %v685_v20 = vsel %vm614_vm15, %v508_v6, %v653_v12  ;;  %v521_v23 = vadd.f32 %v923_v18, %v1127_v22  ;;  %v585_v25 = vadd.f32 %v939_v19, %v1127_v22 }
  0xf3   : > { %731 = vst.msk [vmem:[%s1140_s14 + $0xa0] sm:$0xff] %vm710_vm2, %v698_v15  ;;  %v701_v21 = vsel %vm630_vm0, %v572_v7, %v669_v13  ;;  %718 = vst.msk [vmem:[%s1140_s14 + $0x38] sm:$0xff] %vm710_vm2, %v685_v20  ;;  %vm612_vm1 = vcmp.gt.f32.partialorder %v500_v16, 0.0  ;;  %v651_v26 = vmul.f32 %v1133_v24, %v500_v16  ;;  %vm628_vm3 = vcmp.gt.f32.partialorder %v564_v17, 0.0  ;;  %v512_v28 = vpop.f32.mrf.mxu0  ;;  %v576_v29 = vpop.f32.mrf.mxu1 }
  0xf4   : > { %734 = vst.msk [vmem:[%s1140_s14 + $0xb8] sm:$0xff] %vm710_vm2, %v701_v21  ;;  %v667_v27 = vmul.f32 %v1133_v24, %v564_v17  ;;  %vm617_vm4 = vcmp.gt.f32.partialorder %v521_v23, 0.0  ;;  %v656_v30 = vmul.f32 %v1133_v24, %v521_v23  ;;  %vm633_vm5 = vcmp.gt.f32.partialorder %v585_v25, 0.0 }
  0xf5   : > { %v672_v31 = vmul.f32 %v1133_v24, %v585_v25  ;;  %v683_v32 = vsel %vm612_vm1, %v500_v16, %v651_v26  ;;  %v513_v34 = vadd.f32 %v1127_v22, %v512_v28  ;;  %v577_v35 = vadd.f32 %v1127_v22, %v576_v29  ;;  %v924_v36 = vpop.f32.mrf.mxu0  ;;  %v940_v37 = vpop.f32.mrf.mxu1 }
  0xf6   : > { %v699_v33 = vsel %vm628_vm3, %v564_v17, %v667_v27  ;;  %716 = vst.msk [vmem:[%s1140_s14 + $0x28] sm:$0xff] %vm710_vm2, %v683_v32  ;;  %v688_v38 = vsel %vm617_vm4, %v521_v23, %v656_v30  ;;  %v524_v40 = vadd.f32 %v924_v36, %v1127_v22  ;;  %v588_v41 = vadd.f32 %v940_v37, %v1127_v22 }
  0xf7   : > { %732 = vst.msk [vmem:[%s1140_s14 + $0xa8] sm:$0xff] %vm710_vm2, %v699_v33  ;;  %v704_v39 = vsel %vm633_vm5, %v585_v25, %v672_v31  ;;  %721 = vst.msk [vmem:[%s1140_s14 + $0x50] sm:$0xff] %vm710_vm2, %v688_v38  ;;  %vm615_vm6 = vcmp.gt.f32.partialorder %v513_v34, 0.0  ;;  %v654_v42 = vmul.f32 %v1133_v24, %v513_v34  ;;  %vm631_vm7 = vcmp.gt.f32.partialorder %v577_v35, 0.0  ;;  %v515_v44 = vpop.f32.mrf.mxu0  ;;  %v579_v45 = vpop.f32.mrf.mxu1 }
  0xf8   : > { %737 = vst.msk [vmem:[%s1140_s14 + $0xd0] sm:$0xff] %vm710_vm2, %v704_v39  ;;  %v670_v43 = vmul.f32 %v1133_v24, %v577_v35  ;;  %vm618_vm8 = vcmp.gt.f32.partialorder %v524_v40, 0.0  ;;  %v657_v46 = vmul.f32 %v1133_v24, %v524_v40  ;;  %vm634_vm9 = vcmp.gt.f32.partialorder %v588_v41, 0.0 }
  0xf9   : > { %v673_v47 = vmul.f32 %v1133_v24, %v588_v41  ;;  %v686_v48 = vsel %vm615_vm6, %v513_v34, %v654_v42  ;;  %v516_v50 = vadd.f32 %v1127_v22, %v515_v44  ;;  %v580_v51 = vadd.f32 %v1127_v22, %v579_v45  ;;  %v927_v52 = vpop.f32.mrf.mxu0  ;;  %v943_v53 = vpop.f32.mrf.mxu1 }
  0xfa   : > { %v702_v49 = vsel %vm631_vm7, %v577_v35, %v670_v43  ;;  %719 = vst.msk [vmem:[%s1140_s14 + $0x40] sm:$0xff] %vm710_vm2, %v686_v48  ;;  %v689_v54 = vsel %vm618_vm8, %v524_v40, %v657_v46  ;;  %v537_v56 = vadd.f32 %v927_v52, %v1127_v22  ;;  %v601_v57 = vadd.f32 %v943_v53, %v1127_v22 }
  0xfb   : > { %735 = vst.msk [vmem:[%s1140_s14 + $0xc0] sm:$0xff] %vm710_vm2, %v702_v49  ;;  %v705_v55 = vsel %vm634_vm9, %v588_v41, %v673_v47  ;;  %722 = vst.msk [vmem:[%s1140_s14 + $0x58] sm:$0xff] %vm710_vm2, %v689_v54  ;;  %vm616_vm10 = vcmp.gt.f32.partialorder %v516_v50, 0.0  ;;  %v655_v58 = vmul.f32 %v1133_v24, %v516_v50  ;;  %vm632_vm11 = vcmp.gt.f32.partialorder %v580_v51, 0.0  ;;  %v528_v60 = vpop.f32.mrf.mxu0  ;;  %v592_v61 = vpop.f32.mrf.mxu1 }
  0xfc   : > { %738 = vst.msk [vmem:[%s1140_s14 + $0xd8] sm:$0xff] %vm710_vm2, %v705_v55  ;;  %v671_v59 = vmul.f32 %v1133_v24, %v580_v51  ;;  %vm621_vm12 = vcmp.gt.f32.partialorder %v537_v56, 0.0  ;;  %v660_v62 = vmul.f32 %v1133_v24, %v537_v56  ;;  %vm637_vm13 = vcmp.gt.f32.partialorder %v601_v57, 0.0 }
  0xfd   : > { %v676_v63 = vmul.f32 %v1133_v24, %v601_v57  ;;  %v687_v0 = vsel %vm616_vm10, %v516_v50, %v655_v58  ;;  %v529_v2 = vadd.f32 %v1127_v22, %v528_v60  ;;  %v593_v3 = vadd.f32 %v1127_v22, %v592_v61  ;;  %v928_v4 = vpop.f32.mrf.mxu0  ;;  %v944_v5 = vpop.f32.mrf.mxu1 }
  0xfe   : > { %v703_v1 = vsel %vm632_vm11, %v580_v51, %v671_v59  ;;  %720 = vst.msk [vmem:[%s1140_s14 + $0x48] sm:$0xff] %vm710_vm2, %v687_v0  ;;  %v692_v6 = vsel %vm621_vm12, %v537_v56, %v660_v62  ;;  %v540_v8 = vadd.f32 %v928_v4, %v1127_v22  ;;  %v604_v9 = vadd.f32 %v944_v5, %v1127_v22 }
  0xff   : > { %736 = vst.msk [vmem:[%s1140_s14 + $0xc8] sm:$0xff] %vm710_vm2, %v703_v1  ;;  %v708_v7 = vsel %vm637_vm13, %v601_v57, %v676_v63  ;;  %725 = vst.msk [vmem:[%s1140_s14 + $0x70] sm:$0xff] %vm710_vm2, %v692_v6  ;;  %vm619_vm14 = vcmp.gt.f32.partialorder %v529_v2, 0.0  ;;  %v658_v10 = vmul.f32 %v1133_v24, %v529_v2  ;;  %vm635_vm15 = vcmp.gt.f32.partialorder %v593_v3, 0.0  ;;  %v531_v12 = vpop.f32.mrf.mxu0  ;;  %v595_v13 = vpop.f32.mrf.mxu1 }
 0x100   : > { %741 = vst.msk [vmem:[%s1140_s14 + $0xf0] sm:$0xff] %vm710_vm2, %v708_v7  ;;  %v674_v11 = vmul.f32 %v1133_v24, %v593_v3  ;;  %vm622_vm0 = vcmp.gt.f32.partialorder %v540_v8, 0.0  ;;  %v661_v14 = vmul.f32 %v1133_v24, %v540_v8  ;;  %vm638_vm1 = vcmp.gt.f32.partialorder %v604_v9, 0.0 }
 0x101   : > { %v677_v15 = vmul.f32 %v1133_v24, %v604_v9  ;;  %v690_v16 = vsel %vm619_vm14, %v529_v2, %v658_v10  ;;  %v532_v18 = vadd.f32 %v1127_v22, %v531_v12  ;;  %v596_v19 = vadd.f32 %v1127_v22, %v595_v13 }
 0x102   : > { %v706_v17 = vsel %vm635_vm15, %v593_v3, %v674_v11  ;;  %723 = vst.msk [vmem:[%s1140_s14 + $0x60] sm:$0xff] %vm710_vm2, %v690_v16  ;;  %v693_v20 = vsel %vm622_vm0, %v540_v8, %v661_v14 }
 0x103   : > { %739 = vst.msk [vmem:[%s1140_s14 + $0xe0] sm:$0xff] %vm710_vm2, %v706_v17  ;;  %v709_v21 = vsel %vm638_vm1, %v604_v9, %v677_v15  ;;  %726 = vst.msk [vmem:[%s1140_s14 + $0x78] sm:$0xff] %vm710_vm2, %v693_v20  ;;  %vm620_vm3 = vcmp.gt.f32.partialorder %v532_v18, 0.0  ;;  %v659_v23 = vmul.f32 %v1133_v24, %v532_v18  ;;  %vm636_vm4 = vcmp.gt.f32.partialorder %v596_v19, 0.0 }
 0x104   : > { %742 = vst.msk [vmem:[%s1140_s14 + $0xf8] sm:$0xff] %vm710_vm2, %v709_v21  ;;  %v675_v25 = vmul.f32 %v1133_v24, %v596_v19 }
 0x105   : > { %v691_v26 = vsel %vm620_vm3, %v532_v18, %v659_v23 }
 0x106   : > { %v707_v27 = vsel %vm636_vm4, %v596_v19, %v675_v25  ;;  %724 = vst.msk [vmem:[%s1140_s14 + $0x68] sm:$0xff] %vm710_vm2, %v691_v26 }
 0x107   : > { %740 = vst.msk [vmem:[%s1140_s14 + $0xe8] sm:$0xff] %vm710_vm2, %v707_v27 }
 0x108 PF: > { %s14_s17 = sadd.s32 1, %s1024_s17   ;;  %s1282_s15 = smov %s1020_s16 }
 0x109   : > { %p11_p5 = scmp.ge.s32.totalorder %s14_s17, 4   ;;  %s1283_s16 = smov %s1285_s18 }
 0x10b   :  { %13 = sbr.rel (!%p11_p5) target bundleno = 2 (0x2), region = 66 }

// kernel: ssh_forward.4
= control target key start
LH: loop header
LB: loop body
LE: loop exit
PB: predicated region body
PF: predicated region fallthrough
CT: control target
= control target key end

     0   :  { %s1021_s15 = smov 0   ;;  %s1023_s16 = smov 0   ;;  %s1241_s0 = inlined_call_operand.vmem [shape: bf16[2,256,36], index: 0, kind: input, shape index: {}]   ;;  %s1242_s1 = inlined_call_operand.vmem [shape: bf16[36,8], index: 1, kind: input, shape index: {}]   ;;  %s1243_s2 = inlined_call_operand.vmem [shape: f32[1,8], index: 2, kind: input, shape index: {}]   ;;  %s1244_s3 = inlined_call_operand.vmem [shape: f32[1,8], index: 3, kind: input, shape index: {}]   ;;  %s1245_s4 = inlined_call_operand.vmem [shape: f32[2,256,8], index: 4, kind: output, shape index: {}]  }
   0x1   :  { %s1025_s17 = smov 0  }
   0x2 LB: > { %s26_s18 = sadd.s32 1, %s990_s16  ;;  %p818_p0 = scmp.ge.s32.totalorder %s994_s17, 1  ;;  %s994_s17 = sphi %s1025_s17, %s14_s17   ;;  %s990_s16 = sphi %s1023_s16, %s1247_s16   ;;  %s986_s15 = sphi %s1021_s15, %s1246_s15  }
   0x3   : > { %p28_p1 = scmp.ge.s32.totalorder %s26_s18, 2  ;;  %p183_p2 = scmp.lt.s32.totalorder %s994_s17, 3 }
   0x5   : > { %s1249_s18 = smov (%p28_p1, %s26_s18), 0  ;;  %p184_p3 = pnand %p818_p0, %p183_p2 }
   0x6   : > { %p218_p4 = scmp.lt.s32.totalorder (!%p184_p3), %s986_s15, 1 }
   0x7   : > { %187 = sbr.rel (%p184_p3) target bundleno = 256 (0x100), region = 36 }
   0xc   : > { %v953_v0 = vld [vmem:[%s1242_s1 + $0x10] ss:$0 sps:$4 sm:$0x33]   ;;  %vm426_vm0 = vcmask 1041408   ;;  %v954_v1 = vld [vmem:[%s1242_s1 + $0x8] sm:$0xff]   ;;  %s1251_s15 = smov (!%p218_p4, %s986_s15), 1 }
   0xd   : > { %927 = vmatprep.subr.msk.bf16.mxu0 %vm426_vm0, %v953_v0  ;;  %928 = vmatprep.subr.msk.bf16.mxu1 %vm426_vm0, %v953_v0  ;;  %v428_v2 = vsel %vm426_vm0, %v953_v0, 0  ;;  %v955_v3 = vld [vmem:[%s1242_s1] sm:$0xff]   ;;  %s862_s25 = sshll.u32 %s1251_s15, 7  ;;  %vm377_vm1 = vcmask 293888   ;;  %s863_s5 = sshll.u32 %s1251_s15, 8  ;;  %vm694_vm2 = vcmask 64512  }
   0xe   : > { %884 = vmatpush3.bf16.msra.mxu0 %v428_v2  ;;  %924 = vmatpush3.bf16.msra.mxu1 %v428_v2  ;;  %s1054_s28 = scalar_lea.vmem %s1241_s0, %s862_s25  ;;  %v1091_v20 = vld [vmem:[%s1243_s2] ss:$0 sm:$0xff]  ;;  %s1104_s10 = scalar_lea.vmem %s1245_s4, %s863_s5 }
   0xf   : > { %885 = vmatprep.subr.bf16.mxu0 %v954_v1  ;;  %922 = vmatprep.subr.bf16.mxu1 %v954_v1  ;;  %v956_v4 = vld [vmem:[%s1054_s28] sm:$0xff]   ;;  %v958_v6 = vld [vmem:[%s1054_s28 + $0x8] sm:$0xff]   ;;  %v960_v8 = vld [vmem:[%s1054_s28 + $0x10] sm:$0xff]  }
  0x10   : > { %v957_v5 = vld [vmem:[%s1054_s28 + $0x40] sm:$0xff]   ;;  %889 = vmatprep.mubr.msk.bf16.mxu0 %vm377_vm1, %v956_v4  ;;  %v959_v7 = vld [vmem:[%s1054_s28 + $0x48] sm:$0xff]   ;;  %v961_v9 = vld [vmem:[%s1054_s28 + $0x50] sm:$0xff]  }
  0x11   : > { %905 = vmatprep.mubr.msk.bf16.mxu1 %vm377_vm1, %v957_v5  ;;  %v962_v10 = vld [vmem:[%s1054_s28 + $0x18] sm:$0xff]   ;;  %v964_v12 = vld [vmem:[%s1054_s28 + $0x20] sm:$0xff]   ;;  %v966_v14 = vld [vmem:[%s1054_s28 + $0x28] sm:$0xff]  }
  0x12   : > { %886 = vmatpush3.bf16.msra.mxu0 %v954_v1  ;;  %925 = vmatpush3.bf16.msra.mxu1 %v954_v1  ;;  %v963_v11 = vld [vmem:[%s1054_s28 + $0x58] sm:$0xff]   ;;  %v965_v13 = vld [vmem:[%s1054_s28 + $0x60] sm:$0xff]   ;;  %v967_v15 = vld [vmem:[%s1054_s28 + $0x68] sm:$0xff]  }
  0x13   : > { %887 = vmatprep.subr.bf16.mxu0 %v955_v3  ;;  %923 = vmatprep.subr.bf16.mxu1 %v955_v3  ;;  %v968_v16 = vld [vmem:[%s1054_s28 + $0x30] sm:$0xff]   ;;  %v970_v18 = vld [vmem:[%s1054_s28 + $0x38] sm:$0xff]   ;;  %v1097_v22 = vld [vmem:[%s1244_s3] ss:$0 sm:$0xff] }
  0x14   : > { %v969_v17 = vld [vmem:[%s1054_s28 + $0x70] sm:$0xff]   ;;  %v971_v19 = vld [vmem:[%s1054_s28 + $0x78] sm:$0xff]  }
  0x16   : > { %888 = vmatpush3.bf16.msra.mxu0 %v955_v3  ;;  %926 = vmatpush3.bf16.msra.mxu1 %v955_v3 }
  0x19   : > { %890 = vmatmul.mubr.msk.bf16.vlgmr.msra.gmra.mxu0 %vm377_vm1, %v958_v6  ;;  %906 = vmatmul.mubr.msk.bf16.vlgmr.msra.gmra.mxu1 %vm377_vm1, %v959_v7 }
  0x1a   : > { %893 = vmatprep.mubr.msk.bf16.mxu0 %vm377_vm1, %v960_v8  ;;  %909 = vmatprep.mubr.msk.bf16.mxu1 %vm377_vm1, %v961_v9 }
  0x21   : > { %894 = vmatmul.mubr.msk.bf16.gmra.mxu0 %vm377_vm1, %v962_v10  ;;  %910 = vmatmul.mubr.msk.bf16.gmra.mxu1 %vm377_vm1, %v963_v11 }
  0x22   : > { %897 = vmatprep.mubr.msk.bf16.mxu0 %vm377_vm1, %v964_v12  ;;  %913 = vmatprep.mubr.msk.bf16.mxu1 %vm377_vm1, %v965_v13 }
  0x29   : > { %898 = vmatmul.mubr.msk.bf16.gmra.mxu0 %vm377_vm1, %v966_v14  ;;  %914 = vmatmul.mubr.msk.bf16.gmra.mxu1 %vm377_vm1, %v967_v15 }
  0x2a   : > { %901 = vmatprep.mubr.msk.bf16.mxu0 %vm377_vm1, %v968_v16  ;;  %917 = vmatprep.mubr.msk.bf16.mxu1 %vm377_vm1, %v969_v17 }
  0x31   : > { %902 = vmatmul.mubr.msk.bf16.gmra.mxu0 %vm377_vm1, %v970_v18  ;;  %918 = vmatmul.mubr.msk.bf16.gmra.mxu1 %vm377_vm1, %v971_v19 }
  0xd9   : > { %v891_v21 = vpop.f32.mrf.mxu0  ;;  %v907_v23 = vpop.f32.mrf.mxu1 }
  0xda   : > { %v473_v24 = vadd.f32 %v891_v21, %v1091_v20  ;;  %v537_v25 = vadd.f32 %v907_v23, %v1091_v20 }
  0xdb   : > { %v464_v26 = vpop.f32.mrf.mxu0  ;;  %v528_v27 = vpop.f32.mrf.mxu1 }
  0xdc   : > { %vm593_vm3 = vcmp.gt.f32.partialorder %v473_v24, 0.0  ;;  %v632_v28 = vmul.f32 %v1097_v22, %v473_v24  ;;  %vm609_vm4 = vcmp.gt.f32.partialorder %v537_v25, 0.0  ;;  %v648_v29 = vmul.f32 %v1097_v22, %v537_v25 }
  0xdd   : > { %v465_v30 = vadd.f32 %v1091_v20, %v464_v26  ;;  %v529_v31 = vadd.f32 %v1091_v20, %v528_v27  ;;  %v892_v32 = vpop.f32.mrf.mxu0  ;;  %v908_v33 = vpop.f32.mrf.mxu1 }
  0xde   : > { %v664_v34 = vsel %vm593_vm3, %v473_v24, %v632_v28  ;;  %v680_v35 = vsel %vm609_vm4, %v537_v25, %v648_v29  ;;  %v476_v36 = vadd.f32 %v892_v32, %v1091_v20  ;;  %v540_v37 = vadd.f32 %v908_v33, %v1091_v20 }
  0xdf   : > { %697 = vst.msk [vmem:[%s1104_s10 + $0x10] sm:$0xff] %vm694_vm2, %v664_v34  ;;  %713 = vst.msk [vmem:[%s1104_s10 + $0x90] sm:$0xff] %vm694_vm2, %v680_v35  ;;  %vm591_vm5 = vcmp.gt.f32.partialorder %v465_v30, 0.0  ;;  %v630_v38 = vmul.f32 %v1097_v22, %v465_v30  ;;  %vm607_vm6 = vcmp.gt.f32.partialorder %v529_v31, 0.0  ;;  %v646_v39 = vmul.f32 %v1097_v22, %v529_v31  ;;  %v467_v40 = vpop.f32.mrf.mxu0  ;;  %v531_v41 = vpop.f32.mrf.mxu1 }
  0xe0   : > { %vm594_vm7 = vcmp.gt.f32.partialorder %v476_v36, 0.0  ;;  %v633_v42 = vmul.f32 %v1097_v22, %v476_v36  ;;  %vm610_vm8 = vcmp.gt.f32.partialorder %v540_v37, 0.0  ;;  %v649_v43 = vmul.f32 %v1097_v22, %v540_v37 }
  0xe1   : > { %v662_v44 = vsel %vm591_vm5, %v465_v30, %v630_v38  ;;  %v678_v45 = vsel %vm607_vm6, %v529_v31, %v646_v39  ;;  %v468_v46 = vadd.f32 %v1091_v20, %v467_v40  ;;  %v532_v47 = vadd.f32 %v1091_v20, %v531_v41  ;;  %v895_v48 = vpop.f32.mrf.mxu0  ;;  %v911_v49 = vpop.f32.mrf.mxu1 }
  0xe2   : > { %695 = vst.msk [vmem:[%s1104_s10] sm:$0xff] %vm694_vm2, %v662_v44  ;;  %711 = vst.msk [vmem:[%s1104_s10 + $0x80] sm:$0xff] %vm694_vm2, %v678_v45  ;;  %v665_v50 = vsel %vm594_vm7, %v476_v36, %v633_v42  ;;  %v681_v51 = vsel %vm610_vm8, %v540_v37, %v649_v43  ;;  %v489_v52 = vadd.f32 %v895_v48, %v1091_v20 }
  0xe3   : > { %v553_v53 = vadd.f32 %v911_v49, %v1091_v20  ;;  %698 = vst.msk [vmem:[%s1104_s10 + $0x18] sm:$0xff] %vm694_vm2, %v665_v50  ;;  %714 = vst.msk [vmem:[%s1104_s10 + $0x98] sm:$0xff] %vm694_vm2, %v681_v51  ;;  %vm592_vm9 = vcmp.gt.f32.partialorder %v468_v46, 0.0  ;;  %v631_v54 = vmul.f32 %v1097_v22, %v468_v46  ;;  %vm608_vm10 = vcmp.gt.f32.partialorder %v532_v47, 0.0  ;;  %v480_v56 = vpop.f32.mrf.mxu0  ;;  %v544_v57 = vpop.f32.mrf.mxu1 }
  0xe4   : > { %v647_v55 = vmul.f32 %v1097_v22, %v532_v47  ;;  %vm597_vm11 = vcmp.gt.f32.partialorder %v489_v52, 0.0  ;;  %v636_v58 = vmul.f32 %v1097_v22, %v489_v52  ;;  %v481_v62 = vadd.f32 %v1091_v20, %v480_v56 }
  0xe5   : > { %vm613_vm12 = vcmp.gt.f32.partialorder %v553_v53, 0.0  ;;  %v652_v59 = vmul.f32 %v1097_v22, %v553_v53  ;;  %v663_v60 = vsel %vm592_vm9, %v468_v46, %v631_v54  ;;  %v545_v63 = vadd.f32 %v1091_v20, %v544_v57  ;;  %v896_v0 = vpop.f32.mrf.mxu0  ;;  %v912_v1 = vpop.f32.mrf.mxu1 }
  0xe6   : > { %v679_v61 = vsel %vm608_vm10, %v532_v47, %v647_v55  ;;  %696 = vst.msk [vmem:[%s1104_s10 + $0x8] sm:$0xff] %vm694_vm2, %v663_v60  ;;  %v668_v2 = vsel %vm597_vm11, %v489_v52, %v636_v58  ;;  %v492_v4 = vadd.f32 %v896_v0, %v1091_v20  ;;  %v556_v5 = vadd.f32 %v912_v1, %v1091_v20 }
  0xe7   : > { %712 = vst.msk [vmem:[%s1104_s10 + $0x88] sm:$0xff] %vm694_vm2, %v679_v61  ;;  %v684_v3 = vsel %vm613_vm12, %v553_v53, %v652_v59  ;;  %701 = vst.msk [vmem:[%s1104_s10 + $0x30] sm:$0xff] %vm694_vm2, %v668_v2  ;;  %vm595_vm13 = vcmp.gt.f32.partialorder %v481_v62, 0.0  ;;  %v634_v6 = vmul.f32 %v1097_v22, %v481_v62  ;;  %vm611_vm14 = vcmp.gt.f32.partialorder %v545_v63, 0.0  ;;  %v483_v8 = vpop.f32.mrf.mxu0  ;;  %v547_v9 = vpop.f32.mrf.mxu1 }
  0xe8   : > { %717 = vst.msk [vmem:[%s1104_s10 + $0xb0] sm:$0xff] %vm694_vm2, %v684_v3  ;;  %v650_v7 = vmul.f32 %v1097_v22, %v545_v63  ;;  %vm598_vm15 = vcmp.gt.f32.partialorder %v492_v4, 0.0  ;;  %v637_v10 = vmul.f32 %v1097_v22, %v492_v4  ;;  %vm614_vm0 = vcmp.gt.f32.partialorder %v556_v5, 0.0 }
  0xe9   : > { %v653_v11 = vmul.f32 %v1097_v22, %v556_v5  ;;  %v666_v12 = vsel %vm595_vm13, %v481_v62, %v634_v6  ;;  %v484_v14 = vadd.f32 %v1091_v20, %v483_v8  ;;  %v548_v15 = vadd.f32 %v1091_v20, %v547_v9  ;;  %v899_v16 = vpop.f32.mrf.mxu0  ;;  %v915_v17 = vpop.f32.mrf.mxu1 }
  0xea   : > { %v682_v13 = vsel %vm611_vm14, %v545_v63, %v650_v7  ;;  %699 = vst.msk [vmem:[%s1104_s10 + $0x20] sm:$0xff] %vm694_vm2, %v666_v12  ;;  %v669_v18 = vsel %vm598_vm15, %v492_v4, %v637_v10  ;;  %v505_v21 = vadd.f32 %v899_v16, %v1091_v20  ;;  %v569_v23 = vadd.f32 %v915_v17, %v1091_v20 }
  0xeb   : > { %715 = vst.msk [vmem:[%s1104_s10 + $0xa0] sm:$0xff] %vm694_vm2, %v682_v13  ;;  %v685_v19 = vsel %vm614_vm0, %v556_v5, %v653_v11  ;;  %702 = vst.msk [vmem:[%s1104_s10 + $0x38] sm:$0xff] %vm694_vm2, %v669_v18  ;;  %vm596_vm1 = vcmp.gt.f32.partialorder %v484_v14, 0.0  ;;  %v635_v24 = vmul.f32 %v1097_v22, %v484_v14  ;;  %vm612_vm3 = vcmp.gt.f32.partialorder %v548_v15, 0.0  ;;  %v496_v26 = vpop.f32.mrf.mxu0  ;;  %v560_v27 = vpop.f32.mrf.mxu1 }
  0xec   : > { %718 = vst.msk [vmem:[%s1104_s10 + $0xb8] sm:$0xff] %vm694_vm2, %v685_v19  ;;  %v651_v25 = vmul.f32 %v1097_v22, %v548_v15  ;;  %vm601_vm4 = vcmp.gt.f32.partialorder %v505_v21, 0.0  ;;  %v640_v28 = vmul.f32 %v1097_v22, %v505_v21  ;;  %vm617_vm5 = vcmp.gt.f32.partialorder %v569_v23, 0.0 }
  0xed   : > { %v656_v29 = vmul.f32 %v1097_v22, %v569_v23  ;;  %v667_v30 = vsel %vm596_vm1, %v484_v14, %v635_v24  ;;  %v497_v32 = vadd.f32 %v1091_v20, %v496_v26  ;;  %v561_v33 = vadd.f32 %v1091_v20, %v560_v27  ;;  %v900_v34 = vpop.f32.mrf.mxu0  ;;  %v916_v35 = vpop.f32.mrf.mxu1 }
  0xee   : > { %v683_v31 = vsel %vm612_vm3, %v548_v15, %v651_v25  ;;  %700 = vst.msk [vmem:[%s1104_s10 + $0x28] sm:$0xff] %vm694_vm2, %v667_v30  ;;  %v672_v36 = vsel %vm601_vm4, %v505_v21, %v640_v28  ;;  %v508_v38 = vadd.f32 %v900_v34, %v1091_v20  ;;  %v572_v39 = vadd.f32 %v916_v35, %v1091_v20 }
  0xef   : > { %716 = vst.msk [vmem:[%s1104_s10 + $0xa8] sm:$0xff] %vm694_vm2, %v683_v31  ;;  %v688_v37 = vsel %vm617_vm5, %v569_v23, %v656_v29  ;;  %705 = vst.msk [vmem:[%s1104_s10 + $0x50] sm:$0xff] %vm694_vm2, %v672_v36  ;;  %vm599_vm6 = vcmp.gt.f32.partialorder %v497_v32, 0.0  ;;  %v638_v40 = vmul.f32 %v1097_v22, %v497_v32  ;;  %vm615_vm7 = vcmp.gt.f32.partialorder %v561_v33, 0.0  ;;  %v499_v42 = vpop.f32.mrf.mxu0  ;;  %v563_v43 = vpop.f32.mrf.mxu1 }
  0xf0   : > { %721 = vst.msk [vmem:[%s1104_s10 + $0xd0] sm:$0xff] %vm694_vm2, %v688_v37  ;;  %v654_v41 = vmul.f32 %v1097_v22, %v561_v33  ;;  %vm602_vm8 = vcmp.gt.f32.partialorder %v508_v38, 0.0  ;;  %v641_v44 = vmul.f32 %v1097_v22, %v508_v38  ;;  %vm618_vm9 = vcmp.gt.f32.partialorder %v572_v39, 0.0 }
  0xf1   : > { %v657_v45 = vmul.f32 %v1097_v22, %v572_v39  ;;  %v670_v46 = vsel %vm599_vm6, %v497_v32, %v638_v40  ;;  %v500_v48 = vadd.f32 %v1091_v20, %v499_v42  ;;  %v564_v49 = vadd.f32 %v1091_v20, %v563_v43  ;;  %v903_v50 = vpop.f32.mrf.mxu0  ;;  %v919_v51 = vpop.f32.mrf.mxu1 }
  0xf2   : > { %v686_v47 = vsel %vm615_vm7, %v561_v33, %v654_v41  ;;  %703 = vst.msk [vmem:[%s1104_s10 + $0x40] sm:$0xff] %vm694_vm2, %v670_v46  ;;  %v673_v52 = vsel %vm602_vm8, %v508_v38, %v641_v44  ;;  %v521_v54 = vadd.f32 %v903_v50, %v1091_v20  ;;  %v585_v55 = vadd.f32 %v919_v51, %v1091_v20 }
  0xf3   : > { %719 = vst.msk [vmem:[%s1104_s10 + $0xc0] sm:$0xff] %vm694_vm2, %v686_v47  ;;  %v689_v53 = vsel %vm618_vm9, %v572_v39, %v657_v45  ;;  %706 = vst.msk [vmem:[%s1104_s10 + $0x58] sm:$0xff] %vm694_vm2, %v673_v52  ;;  %vm600_vm10 = vcmp.gt.f32.partialorder %v500_v48, 0.0  ;;  %v639_v56 = vmul.f32 %v1097_v22, %v500_v48  ;;  %vm616_vm11 = vcmp.gt.f32.partialorder %v564_v49, 0.0  ;;  %v512_v58 = vpop.f32.mrf.mxu0  ;;  %v576_v59 = vpop.f32.mrf.mxu1 }
  0xf4   : > { %722 = vst.msk [vmem:[%s1104_s10 + $0xd8] sm:$0xff] %vm694_vm2, %v689_v53  ;;  %v655_v57 = vmul.f32 %v1097_v22, %v564_v49  ;;  %vm605_vm12 = vcmp.gt.f32.partialorder %v521_v54, 0.0  ;;  %v644_v60 = vmul.f32 %v1097_v22, %v521_v54  ;;  %vm621_vm13 = vcmp.gt.f32.partialorder %v585_v55, 0.0 }
  0xf5   : > { %v660_v61 = vmul.f32 %v1097_v22, %v585_v55  ;;  %v671_v62 = vsel %vm600_vm10, %v500_v48, %v639_v56  ;;  %v513_v0 = vadd.f32 %v1091_v20, %v512_v58  ;;  %v577_v1 = vadd.f32 %v1091_v20, %v576_v59  ;;  %v904_v2 = vpop.f32.mrf.mxu0  ;;  %v920_v3 = vpop.f32.mrf.mxu1 }
  0xf6   : > { %v687_v63 = vsel %vm616_vm11, %v564_v49, %v655_v57  ;;  %704 = vst.msk [vmem:[%s1104_s10 + $0x48] sm:$0xff] %vm694_vm2, %v671_v62  ;;  %v676_v4 = vsel %vm605_vm12, %v521_v54, %v644_v60  ;;  %v524_v6 = vadd.f32 %v904_v2, %v1091_v20  ;;  %v588_v7 = vadd.f32 %v920_v3, %v1091_v20 }
  0xf7   : > { %720 = vst.msk [vmem:[%s1104_s10 + $0xc8] sm:$0xff] %vm694_vm2, %v687_v63  ;;  %v692_v5 = vsel %vm621_vm13, %v585_v55, %v660_v61  ;;  %709 = vst.msk [vmem:[%s1104_s10 + $0x70] sm:$0xff] %vm694_vm2, %v676_v4  ;;  %vm603_vm14 = vcmp.gt.f32.partialorder %v513_v0, 0.0  ;;  %v642_v8 = vmul.f32 %v1097_v22, %v513_v0  ;;  %vm619_vm15 = vcmp.gt.f32.partialorder %v577_v1, 0.0  ;;  %v515_v10 = vpop.f32.mrf.mxu0  ;;  %v579_v11 = vpop.f32.mrf.mxu1 }
  0xf8   : > { %725 = vst.msk [vmem:[%s1104_s10 + $0xf0] sm:$0xff] %vm694_vm2, %v692_v5  ;;  %v658_v9 = vmul.f32 %v1097_v22, %v577_v1  ;;  %vm606_vm0 = vcmp.gt.f32.partialorder %v524_v6, 0.0  ;;  %v645_v12 = vmul.f32 %v1097_v22, %v524_v6  ;;  %vm622_vm1 = vcmp.gt.f32.partialorder %v588_v7, 0.0 }
  0xf9   : > { %v661_v13 = vmul.f32 %v1097_v22, %v588_v7  ;;  %v674_v14 = vsel %vm603_vm14, %v513_v0, %v642_v8  ;;  %v516_v16 = vadd.f32 %v1091_v20, %v515_v10  ;;  %v580_v17 = vadd.f32 %v1091_v20, %v579_v11 }
  0xfa   : > { %v690_v15 = vsel %vm619_vm15, %v577_v1, %v658_v9  ;;  %707 = vst.msk [vmem:[%s1104_s10 + $0x60] sm:$0xff] %vm694_vm2, %v674_v14  ;;  %v677_v18 = vsel %vm606_vm0, %v524_v6, %v645_v12 }
  0xfb   : > { %723 = vst.msk [vmem:[%s1104_s10 + $0xe0] sm:$0xff] %vm694_vm2, %v690_v15  ;;  %v693_v19 = vsel %vm622_vm1, %v588_v7, %v661_v13  ;;  %710 = vst.msk [vmem:[%s1104_s10 + $0x78] sm:$0xff] %vm694_vm2, %v677_v18  ;;  %vm604_vm3 = vcmp.gt.f32.partialorder %v516_v16, 0.0  ;;  %v643_v21 = vmul.f32 %v1097_v22, %v516_v16  ;;  %vm620_vm4 = vcmp.gt.f32.partialorder %v580_v17, 0.0 }
  0xfc   : > { %726 = vst.msk [vmem:[%s1104_s10 + $0xf8] sm:$0xff] %vm694_vm2, %v693_v19  ;;  %v659_v23 = vmul.f32 %v1097_v22, %v580_v17 }
  0xfd   : > { %v675_v24 = vsel %vm604_vm3, %v516_v16, %v643_v21 }
  0xfe   : > { %v691_v25 = vsel %vm620_vm4, %v580_v17, %v659_v23  ;;  %708 = vst.msk [vmem:[%s1104_s10 + $0x68] sm:$0xff] %vm694_vm2, %v675_v24 }
  0xff   : > { %724 = vst.msk [vmem:[%s1104_s10 + $0xe8] sm:$0xff] %vm694_vm2, %v691_v25 }
 0x100 PF: > { %s14_s17 = sadd.s32 1, %s994_s17   ;;  %s1246_s15 = smov %s990_s16 }
 0x101   : > { %p11_p5 = scmp.ge.s32.totalorder %s14_s17, 4   ;;  %s1247_s16 = smov %s1249_s18 }
 0x103   :  { %13 = sbr.rel (!%p11_p5) target bundleno = 2 (0x2), region = 66 }

// kernel: ssh_forward.5
= control target key start
LH: loop header
LB: loop body
LE: loop exit
PB: predicated region body
PF: predicated region fallthrough
CT: control target
= control target key end

     0   :  { %s1021_s15 = smov 0   ;;  %s1023_s16 = smov 0   ;;  %s1241_s0 = inlined_call_operand.vmem [shape: bf16[2,256,36], index: 0, kind: input, shape index: {}]   ;;  %s1242_s1 = inlined_call_operand.vmem [shape: bf16[36,4], index: 1, kind: input, shape index: {}]   ;;  %s1243_s2 = inlined_call_operand.vmem [shape: f32[1,4], index: 2, kind: input, shape index: {}]   ;;  %s1244_s3 = inlined_call_operand.vmem [shape: f32[1,4], index: 3, kind: input, shape index: {}]   ;;  %s1245_s4 = inlined_call_operand.vmem [shape: f32[2,256,4], index: 4, kind: output, shape index: {}]  }
   0x1   :  { %s1025_s17 = smov 0  }
   0x2 LB: > { %s26_s18 = sadd.s32 1, %s990_s16  ;;  %p818_p0 = scmp.ge.s32.totalorder %s994_s17, 1  ;;  %s994_s17 = sphi %s1025_s17, %s14_s17   ;;  %s990_s16 = sphi %s1023_s16, %s1247_s16   ;;  %s986_s15 = sphi %s1021_s15, %s1246_s15  }
   0x3   : > { %p28_p1 = scmp.ge.s32.totalorder %s26_s18, 2  ;;  %p183_p2 = scmp.lt.s32.totalorder %s994_s17, 3 }
   0x5   : > { %s1249_s18 = smov (%p28_p1, %s26_s18), 0  ;;  %p184_p3 = pnand %p818_p0, %p183_p2 }
   0x6   : > { %p218_p4 = scmp.lt.s32.totalorder (!%p184_p3), %s986_s15, 1 }
   0x7   : > { %187 = sbr.rel (%p184_p3) target bundleno = 256 (0x100), region = 36 }
   0xc   : > { %v953_v0 = vld [vmem:[%s1242_s1 + $0x10] ss:$0 sps:$4 sm:$0x33]   ;;  %vm426_vm0 = vcmask 1041408   ;;  %v954_v1 = vld [vmem:[%s1242_s1 + $0x8] sm:$0xff]   ;;  %s1251_s15 = smov (!%p218_p4, %s986_s15), 1 }
   0xd   : > { %927 = vmatprep.subr.msk.bf16.mxu0 %vm426_vm0, %v953_v0  ;;  %928 = vmatprep.subr.msk.bf16.mxu1 %vm426_vm0, %v953_v0  ;;  %v428_v2 = vsel %vm426_vm0, %v953_v0, 0  ;;  %v955_v3 = vld [vmem:[%s1242_s1] sm:$0xff]   ;;  %s862_s25 = sshll.u32 %s1251_s15, 7  ;;  %vm377_vm1 = vcmask 293888   ;;  %s863_s5 = sshll.u32 %s1251_s15, 8  ;;  %vm694_vm2 = vcmask 31744  }
   0xe   : > { %884 = vmatpush3.bf16.msra.mxu0 %v428_v2  ;;  %924 = vmatpush3.bf16.msra.mxu1 %v428_v2  ;;  %s1054_s28 = scalar_lea.vmem %s1241_s0, %s862_s25  ;;  %v1091_v20 = vld [vmem:[%s1243_s2] ss:$0 sm:$0xff]  ;;  %s1104_s10 = scalar_lea.vmem %s1245_s4, %s863_s5 }
   0xf   : > { %885 = vmatprep.subr.bf16.mxu0 %v954_v1  ;;  %922 = vmatprep.subr.bf16.mxu1 %v954_v1  ;;  %v956_v4 = vld [vmem:[%s1054_s28] sm:$0xff]   ;;  %v958_v6 = vld [vmem:[%s1054_s28 + $0x8] sm:$0xff]   ;;  %v960_v8 = vld [vmem:[%s1054_s28 + $0x10] sm:$0xff]  }
  0x10   : > { %v957_v5 = vld [vmem:[%s1054_s28 + $0x40] sm:$0xff]   ;;  %889 = vmatprep.mubr.msk.bf16.mxu0 %vm377_vm1, %v956_v4  ;;  %v959_v7 = vld [vmem:[%s1054_s28 + $0x48] sm:$0xff]   ;;  %v961_v9 = vld [vmem:[%s1054_s28 + $0x50] sm:$0xff]  }
  0x11   : > { %905 = vmatprep.mubr.msk.bf16.mxu1 %vm377_vm1, %v957_v5  ;;  %v962_v10 = vld [vmem:[%s1054_s28 + $0x18] sm:$0xff]   ;;  %v964_v12 = vld [vmem:[%s1054_s28 + $0x20] sm:$0xff]   ;;  %v966_v14 = vld [vmem:[%s1054_s28 + $0x28] sm:$0xff]  }
  0x12   : > { %886 = vmatpush3.bf16.msra.mxu0 %v954_v1  ;;  %925 = vmatpush3.bf16.msra.mxu1 %v954_v1  ;;  %v963_v11 = vld [vmem:[%s1054_s28 + $0x58] sm:$0xff]   ;;  %v965_v13 = vld [vmem:[%s1054_s28 + $0x60] sm:$0xff]   ;;  %v967_v15 = vld [vmem:[%s1054_s28 + $0x68] sm:$0xff]  }
  0x13   : > { %887 = vmatprep.subr.bf16.mxu0 %v955_v3  ;;  %923 = vmatprep.subr.bf16.mxu1 %v955_v3  ;;  %v968_v16 = vld [vmem:[%s1054_s28 + $0x30] sm:$0xff]   ;;  %v970_v18 = vld [vmem:[%s1054_s28 + $0x38] sm:$0xff]   ;;  %v1097_v22 = vld [vmem:[%s1244_s3] ss:$0 sm:$0xff] }
  0x14   : > { %v969_v17 = vld [vmem:[%s1054_s28 + $0x70] sm:$0xff]   ;;  %v971_v19 = vld [vmem:[%s1054_s28 + $0x78] sm:$0xff]  }
  0x16   : > { %888 = vmatpush3.bf16.msra.mxu0 %v955_v3  ;;  %926 = vmatpush3.bf16.msra.mxu1 %v955_v3 }
  0x19   : > { %890 = vmatmul.mubr.msk.bf16.vlgmr.msra.gmra.mxu0 %vm377_vm1, %v958_v6  ;;  %906 = vmatmul.mubr.msk.bf16.vlgmr.msra.gmra.mxu1 %vm377_vm1, %v959_v7 }
  0x1a   : > { %893 = vmatprep.mubr.msk.bf16.mxu0 %vm377_vm1, %v960_v8  ;;  %909 = vmatprep.mubr.msk.bf16.mxu1 %vm377_vm1, %v961_v9 }
  0x21   : > { %894 = vmatmul.mubr.msk.bf16.gmra.mxu0 %vm377_vm1, %v962_v10  ;;  %910 = vmatmul.mubr.msk.bf16.gmra.mxu1 %vm377_vm1, %v963_v11 }
  0x22   : > { %897 = vmatprep.mubr.msk.bf16.mxu0 %vm377_vm1, %v964_v12  ;;  %913 = vmatprep.mubr.msk.bf16.mxu1 %vm377_vm1, %v965_v13 }
  0x29   : > { %898 = vmatmul.mubr.msk.bf16.gmra.mxu0 %vm377_vm1, %v966_v14  ;;  %914 = vmatmul.mubr.msk.bf16.gmra.mxu1 %vm377_vm1, %v967_v15 }
  0x2a   : > { %901 = vmatprep.mubr.msk.bf16.mxu0 %vm377_vm1, %v968_v16  ;;  %917 = vmatprep.mubr.msk.bf16.mxu1 %vm377_vm1, %v969_v17 }
  0x31   : > { %902 = vmatmul.mubr.msk.bf16.gmra.mxu0 %vm377_vm1, %v970_v18  ;;  %918 = vmatmul.mubr.msk.bf16.gmra.mxu1 %vm377_vm1, %v971_v19 }
  0xd9   : > { %v891_v21 = vpop.f32.mrf.mxu0  ;;  %v907_v23 = vpop.f32.mrf.mxu1 }
  0xda   : > { %v473_v24 = vadd.f32 %v891_v21, %v1091_v20  ;;  %v537_v25 = vadd.f32 %v907_v23, %v1091_v20 }
  0xdb   : > { %v464_v26 = vpop.f32.mrf.mxu0  ;;  %v528_v27 = vpop.f32.mrf.mxu1 }
  0xdc   : > { %vm593_vm3 = vcmp.gt.f32.partialorder %v473_v24, 0.0  ;;  %v632_v28 = vmul.f32 %v1097_v22, %v473_v24  ;;  %vm609_vm4 = vcmp.gt.f32.partialorder %v537_v25, 0.0  ;;  %v648_v29 = vmul.f32 %v1097_v22, %v537_v25 }
  0xdd   : > { %v465_v30 = vadd.f32 %v1091_v20, %v464_v26  ;;  %v529_v31 = vadd.f32 %v1091_v20, %v528_v27  ;;  %v892_v32 = vpop.f32.mrf.mxu0  ;;  %v908_v33 = vpop.f32.mrf.mxu1 }
  0xde   : > { %v664_v34 = vsel %vm593_vm3, %v473_v24, %v632_v28  ;;  %v680_v35 = vsel %vm609_vm4, %v537_v25, %v648_v29  ;;  %v476_v36 = vadd.f32 %v892_v32, %v1091_v20  ;;  %v540_v37 = vadd.f32 %v908_v33, %v1091_v20 }
  0xdf   : > { %697 = vst.msk [vmem:[%s1104_s10 + $0x10] sm:$0xff] %vm694_vm2, %v664_v34  ;;  %713 = vst.msk [vmem:[%s1104_s10 + $0x90] sm:$0xff] %vm694_vm2, %v680_v35  ;;  %vm591_vm5 = vcmp.gt.f32.partialorder %v465_v30, 0.0  ;;  %v630_v38 = vmul.f32 %v1097_v22, %v465_v30  ;;  %vm607_vm6 = vcmp.gt.f32.partialorder %v529_v31, 0.0  ;;  %v646_v39 = vmul.f32 %v1097_v22, %v529_v31  ;;  %v467_v40 = vpop.f32.mrf.mxu0  ;;  %v531_v41 = vpop.f32.mrf.mxu1 }
  0xe0   : > { %vm594_vm7 = vcmp.gt.f32.partialorder %v476_v36, 0.0  ;;  %v633_v42 = vmul.f32 %v1097_v22, %v476_v36  ;;  %vm610_vm8 = vcmp.gt.f32.partialorder %v540_v37, 0.0  ;;  %v649_v43 = vmul.f32 %v1097_v22, %v540_v37 }
  0xe1   : > { %v662_v44 = vsel %vm591_vm5, %v465_v30, %v630_v38  ;;  %v678_v45 = vsel %vm607_vm6, %v529_v31, %v646_v39  ;;  %v468_v46 = vadd.f32 %v1091_v20, %v467_v40  ;;  %v532_v47 = vadd.f32 %v1091_v20, %v531_v41  ;;  %v895_v48 = vpop.f32.mrf.mxu0  ;;  %v911_v49 = vpop.f32.mrf.mxu1 }
  0xe2   : > { %695 = vst.msk [vmem:[%s1104_s10] sm:$0xff] %vm694_vm2, %v662_v44  ;;  %711 = vst.msk [vmem:[%s1104_s10 + $0x80] sm:$0xff] %vm694_vm2, %v678_v45  ;;  %v665_v50 = vsel %vm594_vm7, %v476_v36, %v633_v42  ;;  %v681_v51 = vsel %vm610_vm8, %v540_v37, %v649_v43  ;;  %v489_v52 = vadd.f32 %v895_v48, %v1091_v20 }
  0xe3   : > { %v553_v53 = vadd.f32 %v911_v49, %v1091_v20  ;;  %698 = vst.msk [vmem:[%s1104_s10 + $0x18] sm:$0xff] %vm694_vm2, %v665_v50  ;;  %714 = vst.msk [vmem:[%s1104_s10 + $0x98] sm:$0xff] %vm694_vm2, %v681_v51  ;;  %vm592_vm9 = vcmp.gt.f32.partialorder %v468_v46, 0.0  ;;  %v631_v54 = vmul.f32 %v1097_v22, %v468_v46  ;;  %vm608_vm10 = vcmp.gt.f32.partialorder %v532_v47, 0.0  ;;  %v480_v56 = vpop.f32.mrf.mxu0  ;;  %v544_v57 = vpop.f32.mrf.mxu1 }
  0xe4   : > { %v647_v55 = vmul.f32 %v1097_v22, %v532_v47  ;;  %vm597_vm11 = vcmp.gt.f32.partialorder %v489_v52, 0.0  ;;  %v636_v58 = vmul.f32 %v1097_v22, %v489_v52  ;;  %v481_v62 = vadd.f32 %v1091_v20, %v480_v56 }
  0xe5   : > { %vm613_vm12 = vcmp.gt.f32.partialorder %v553_v53, 0.0  ;;  %v652_v59 = vmul.f32 %v1097_v22, %v553_v53  ;;  %v663_v60 = vsel %vm592_vm9, %v468_v46, %v631_v54  ;;  %v545_v63 = vadd.f32 %v1091_v20, %v544_v57  ;;  %v896_v0 = vpop.f32.mrf.mxu0  ;;  %v912_v1 = vpop.f32.mrf.mxu1 }
  0xe6   : > { %v679_v61 = vsel %vm608_vm10, %v532_v47, %v647_v55  ;;  %696 = vst.msk [vmem:[%s1104_s10 + $0x8] sm:$0xff] %vm694_vm2, %v663_v60  ;;  %v668_v2 = vsel %vm597_vm11, %v489_v52, %v636_v58  ;;  %v492_v4 = vadd.f32 %v896_v0, %v1091_v20  ;;  %v556_v5 = vadd.f32 %v912_v1, %v1091_v20 }
  0xe7   : > { %712 = vst.msk [vmem:[%s1104_s10 + $0x88] sm:$0xff] %vm694_vm2, %v679_v61  ;;  %v684_v3 = vsel %vm613_vm12, %v553_v53, %v652_v59  ;;  %701 = vst.msk [vmem:[%s1104_s10 + $0x30] sm:$0xff] %vm694_vm2, %v668_v2  ;;  %vm595_vm13 = vcmp.gt.f32.partialorder %v481_v62, 0.0  ;;  %v634_v6 = vmul.f32 %v1097_v22, %v481_v62  ;;  %vm611_vm14 = vcmp.gt.f32.partialorder %v545_v63, 0.0  ;;  %v483_v8 = vpop.f32.mrf.mxu0  ;;  %v547_v9 = vpop.f32.mrf.mxu1 }
  0xe8   : > { %717 = vst.msk [vmem:[%s1104_s10 + $0xb0] sm:$0xff] %vm694_vm2, %v684_v3  ;;  %v650_v7 = vmul.f32 %v1097_v22, %v545_v63  ;;  %vm598_vm15 = vcmp.gt.f32.partialorder %v492_v4, 0.0  ;;  %v637_v10 = vmul.f32 %v1097_v22, %v492_v4  ;;  %vm614_vm0 = vcmp.gt.f32.partialorder %v556_v5, 0.0 }
  0xe9   : > { %v653_v11 = vmul.f32 %v1097_v22, %v556_v5  ;;  %v666_v12 = vsel %vm595_vm13, %v481_v62, %v634_v6  ;;  %v484_v14 = vadd.f32 %v1091_v20, %v483_v8  ;;  %v548_v15 = vadd.f32 %v1091_v20, %v547_v9  ;;  %v899_v16 = vpop.f32.mrf.mxu0  ;;  %v915_v17 = vpop.f32.mrf.mxu1 }
  0xea   : > { %v682_v13 = vsel %vm611_vm14, %v545_v63, %v650_v7  ;;  %699 = vst.msk [vmem:[%s1104_s10 + $0x20] sm:$0xff] %vm694_vm2, %v666_v12  ;;  %v669_v18 = vsel %vm598_vm15, %v492_v4, %v637_v10  ;;  %v505_v21 = vadd.f32 %v899_v16, %v1091_v20  ;;  %v569_v23 = vadd.f32 %v915_v17, %v1091_v20 }
  0xeb   : > { %715 = vst.msk [vmem:[%s1104_s10 + $0xa0] sm:$0xff] %vm694_vm2, %v682_v13  ;;  %v685_v19 = vsel %vm614_vm0, %v556_v5, %v653_v11  ;;  %702 = vst.msk [vmem:[%s1104_s10 + $0x38] sm:$0xff] %vm694_vm2, %v669_v18  ;;  %vm596_vm1 = vcmp.gt.f32.partialorder %v484_v14, 0.0  ;;  %v635_v24 = vmul.f32 %v1097_v22, %v484_v14  ;;  %vm612_vm3 = vcmp.gt.f32.partialorder %v548_v15, 0.0  ;;  %v496_v26 = vpop.f32.mrf.mxu0  ;;  %v560_v27 = vpop.f32.mrf.mxu1 }
  0xec   : > { %718 = vst.msk [vmem:[%s1104_s10 + $0xb8] sm:$0xff] %vm694_vm2, %v685_v19  ;;  %v651_v25 = vmul.f32 %v1097_v22, %v548_v15  ;;  %vm601_vm4 = vcmp.gt.f32.partialorder %v505_v21, 0.0  ;;  %v640_v28 = vmul.f32 %v1097_v22, %v505_v21  ;;  %vm617_vm5 = vcmp.gt.f32.partialorder %v569_v23, 0.0 }
  0xed   : > { %v656_v29 = vmul.f32 %v1097_v22, %v569_v23  ;;  %v667_v30 = vsel %vm596_vm1, %v484_v14, %v635_v24  ;;  %v497_v32 = vadd.f32 %v1091_v20, %v496_v26  ;;  %v561_v33 = vadd.f32 %v1091_v20, %v560_v27  ;;  %v900_v34 = vpop.f32.mrf.mxu0  ;;  %v916_v35 = vpop.f32.mrf.mxu1 }
  0xee   : > { %v683_v31 = vsel %vm612_vm3, %v548_v15, %v651_v25  ;;  %700 = vst.msk [vmem:[%s1104_s10 + $0x28] sm:$0xff] %vm694_vm2, %v667_v30  ;;  %v672_v36 = vsel %vm601_vm4, %v505_v21, %v640_v28  ;;  %v508_v38 = vadd.f32 %v900_v34, %v1091_v20  ;;  %v572_v39 = vadd.f32 %v916_v35, %v1091_v20 }
  0xef   : > { %716 = vst.msk [vmem:[%s1104_s10 + $0xa8] sm:$0xff] %vm694_vm2, %v683_v31  ;;  %v688_v37 = vsel %vm617_vm5, %v569_v23, %v656_v29  ;;  %705 = vst.msk [vmem:[%s1104_s10 + $0x50] sm:$0xff] %vm694_vm2, %v672_v36  ;;  %vm599_vm6 = vcmp.gt.f32.partialorder %v497_v32, 0.0  ;;  %v638_v40 = vmul.f32 %v1097_v22, %v497_v32  ;;  %vm615_vm7 = vcmp.gt.f32.partialorder %v561_v33, 0.0  ;;  %v499_v42 = vpop.f32.mrf.mxu0  ;;  %v563_v43 = vpop.f32.mrf.mxu1 }
  0xf0   : > { %721 = vst.msk [vmem:[%s1104_s10 + $0xd0] sm:$0xff] %vm694_vm2, %v688_v37  ;;  %v654_v41 = vmul.f32 %v1097_v22, %v561_v33  ;;  %vm602_vm8 = vcmp.gt.f32.partialorder %v508_v38, 0.0  ;;  %v641_v44 = vmul.f32 %v1097_v22, %v508_v38  ;;  %vm618_vm9 = vcmp.gt.f32.partialorder %v572_v39, 0.0 }
  0xf1   : > { %v657_v45 = vmul.f32 %v1097_v22, %v572_v39  ;;  %v670_v46 = vsel %vm599_vm6, %v497_v32, %v638_v40  ;;  %v500_v48 = vadd.f32 %v1091_v20, %v499_v42  ;;  %v564_v49 = vadd.f32 %v1091_v20, %v563_v43  ;;  %v903_v50 = vpop.f32.mrf.mxu0  ;;  %v919_v51 = vpop.f32.mrf.mxu1 }
  0xf2   : > { %v686_v47 = vsel %vm615_vm7, %v561_v33, %v654_v41  ;;  %703 = vst.msk [vmem:[%s1104_s10 + $0x40] sm:$0xff] %vm694_vm2, %v670_v46  ;;  %v673_v52 = vsel %vm602_vm8, %v508_v38, %v641_v44  ;;  %v521_v54 = vadd.f32 %v903_v50, %v1091_v20  ;;  %v585_v55 = vadd.f32 %v919_v51, %v1091_v20 }
  0xf3   : > { %719 = vst.msk [vmem:[%s1104_s10 + $0xc0] sm:$0xff] %vm694_vm2, %v686_v47  ;;  %v689_v53 = vsel %vm618_vm9, %v572_v39, %v657_v45  ;;  %706 = vst.msk [vmem:[%s1104_s10 + $0x58] sm:$0xff] %vm694_vm2, %v673_v52  ;;  %vm600_vm10 = vcmp.gt.f32.partialorder %v500_v48, 0.0  ;;  %v639_v56 = vmul.f32 %v1097_v22, %v500_v48  ;;  %vm616_vm11 = vcmp.gt.f32.partialorder %v564_v49, 0.0  ;;  %v512_v58 = vpop.f32.mrf.mxu0  ;;  %v576_v59 = vpop.f32.mrf.mxu1 }
  0xf4   : > { %722 = vst.msk [vmem:[%s1104_s10 + $0xd8] sm:$0xff] %vm694_vm2, %v689_v53  ;;  %v655_v57 = vmul.f32 %v1097_v22, %v564_v49  ;;  %vm605_vm12 = vcmp.gt.f32.partialorder %v521_v54, 0.0  ;;  %v644_v60 = vmul.f32 %v1097_v22, %v521_v54  ;;  %vm621_vm13 = vcmp.gt.f32.partialorder %v585_v55, 0.0 }
  0xf5   : > { %v660_v61 = vmul.f32 %v1097_v22, %v585_v55  ;;  %v671_v62 = vsel %vm600_vm10, %v500_v48, %v639_v56  ;;  %v513_v0 = vadd.f32 %v1091_v20, %v512_v58  ;;  %v577_v1 = vadd.f32 %v1091_v20, %v576_v59  ;;  %v904_v2 = vpop.f32.mrf.mxu0  ;;  %v920_v3 = vpop.f32.mrf.mxu1 }
  0xf6   : > { %v687_v63 = vsel %vm616_vm11, %v564_v49, %v655_v57  ;;  %704 = vst.msk [vmem:[%s1104_s10 + $0x48] sm:$0xff] %vm694_vm2, %v671_v62  ;;  %v676_v4 = vsel %vm605_vm12, %v521_v54, %v644_v60  ;;  %v524_v6 = vadd.f32 %v904_v2, %v1091_v20  ;;  %v588_v7 = vadd.f32 %v920_v3, %v1091_v20 }
  0xf7   : > { %720 = vst.msk [vmem:[%s1104_s10 + $0xc8] sm:$0xff] %vm694_vm2, %v687_v63  ;;  %v692_v5 = vsel %vm621_vm13, %v585_v55, %v660_v61  ;;  %709 = vst.msk [vmem:[%s1104_s10 + $0x70] sm:$0xff] %vm694_vm2, %v676_v4  ;;  %vm603_vm14 = vcmp.gt.f32.partialorder %v513_v0, 0.0  ;;  %v642_v8 = vmul.f32 %v1097_v22, %v513_v0  ;;  %vm619_vm15 = vcmp.gt.f32.partialorder %v577_v1, 0.0  ;;  %v515_v10 = vpop.f32.mrf.mxu0  ;;  %v579_v11 = vpop.f32.mrf.mxu1 }
  0xf8   : > { %725 = vst.msk [vmem:[%s1104_s10 + $0xf0] sm:$0xff] %vm694_vm2, %v692_v5  ;;  %v658_v9 = vmul.f32 %v1097_v22, %v577_v1  ;;  %vm606_vm0 = vcmp.gt.f32.partialorder %v524_v6, 0.0  ;;  %v645_v12 = vmul.f32 %v1097_v22, %v524_v6  ;;  %vm622_vm1 = vcmp.gt.f32.partialorder %v588_v7, 0.0 }
  0xf9   : > { %v661_v13 = vmul.f32 %v1097_v22, %v588_v7  ;;  %v674_v14 = vsel %vm603_vm14, %v513_v0, %v642_v8  ;;  %v516_v16 = vadd.f32 %v1091_v20, %v515_v10  ;;  %v580_v17 = vadd.f32 %v1091_v20, %v579_v11 }
  0xfa   : > { %v690_v15 = vsel %vm619_vm15, %v577_v1, %v658_v9  ;;  %707 = vst.msk [vmem:[%s1104_s10 + $0x60] sm:$0xff] %vm694_vm2, %v674_v14  ;;  %v677_v18 = vsel %vm606_vm0, %v524_v6, %v645_v12 }
  0xfb   : > { %723 = vst.msk [vmem:[%s1104_s10 + $0xe0] sm:$0xff] %vm694_vm2, %v690_v15  ;;  %v693_v19 = vsel %vm622_vm1, %v588_v7, %v661_v13  ;;  %710 = vst.msk [vmem:[%s1104_s10 + $0x78] sm:$0xff] %vm694_vm2, %v677_v18  ;;  %vm604_vm3 = vcmp.gt.f32.partialorder %v516_v16, 0.0  ;;  %v643_v21 = vmul.f32 %v1097_v22, %v516_v16  ;;  %vm620_vm4 = vcmp.gt.f32.partialorder %v580_v17, 0.0 }
  0xfc   : > { %726 = vst.msk [vmem:[%s1104_s10 + $0xf8] sm:$0xff] %vm694_vm2, %v693_v19  ;;  %v659_v23 = vmul.f32 %v1097_v22, %v580_v17 }
  0xfd   : > { %v675_v24 = vsel %vm604_vm3, %v516_v16, %v643_v21 }
  0xfe   : > { %v691_v25 = vsel %vm620_vm4, %v580_v17, %v659_v23  ;;  %708 = vst.msk [vmem:[%s1104_s10 + $0x68] sm:$0xff] %vm694_vm2, %v675_v24 }
  0xff   : > { %724 = vst.msk [vmem:[%s1104_s10 + $0xe8] sm:$0xff] %vm694_vm2, %v691_v25 }
 0x100 PF: > { %s14_s17 = sadd.s32 1, %s994_s17   ;;  %s1246_s15 = smov %s990_s16 }
 0x101   : > { %p11_p5 = scmp.ge.s32.totalorder %s14_s17, 4   ;;  %s1247_s16 = smov %s1249_s18 }
 0x103   :  { %13 = sbr.rel (!%p11_p5) target bundleno = 2 (0x2), region = 66 }

</bundles_post_ra>
